<compile_context>
chip_gen: v7x
topology: tpu7x:2x2x1
jax: 0.10.0
libtpu: 0.0.40
codegen_flags: <defaults>
</compile_context>

<pallas_src>
import functools

import jax
import jax.numpy as jnp
from jax import lax
from jax.experimental import pallas as pl
from jax.experimental.pallas import tpu as pltpu


# ----------------------------------------------------------------------------
# Pallas kernel: one modality-group LSTM, one batch tile, returns last hidden.
# ----------------------------------------------------------------------------
def _lstm_group_kernel(x_ref, wih_ref, whh_ref, b_ref, hout_ref, g_scr, *,
                       t_chunk, inner_unroll):
    # x_ref   : (1, S, TB, D_pad)        bf16, full sequence for this batch tile
    # wih_ref : (1, D_pad, 4*H_pad)      bf16
    # whh_ref : (1, H_pad, 4*H_pad)      bf16
    # b_ref   : (1, 1, 4*H_pad)          f32 (b_ih + b_hh)
    # hout_ref: (1, TB, H_pad)           f32, lane-dense output slab
    # g_scr   : (n_slots, TC, TB, 4*H_pad) f32, chunked input-projection scratch
    s_len = x_ref.shape[1]
    tb = x_ref.shape[2]
    d_pad = x_ref.shape[3]
    h_pad = hout_ref.shape[-1]
    n_chunks = -(-s_len // t_chunk)
    n_slots = g_scr.shape[0]

    def project(ck, slot):
        # Input projection for one time chunk: (L*TB, D) x (D, 4H) on the MXU.
        start = ck * t_chunk
        length = min(t_chunk, s_len - start)
        xc = x_ref[0, start:start + length]                        # (L, TB, D)
        g = jnp.dot(xc.reshape(length * tb, d_pad), wih_ref[0],
                    preferred_element_type=jnp.float32) + b_ref[0]
        g_scr[slot, :length] = g.reshape(length, tb, 4 * h_pad)

    def run_chunk(ck, slot, carry):
        length = min(t_chunk, s_len - ck * t_chunk)

        def step(t, hc):
            h_prev, c_prev = hc
            gates = g_scr[slot, t] + jnp.dot(
                h_prev.astype(whh_ref.dtype), whh_ref[0],
                preferred_element_type=jnp.float32)                # (TB, 4H)
            # Gate order is [i, f, o, g]: one contiguous sigmoid block + tanh.
            sig = jax.nn.sigmoid(gates[:, :3 * h_pad])
            i_g = sig[:, :h_pad]
            f_g = sig[:, h_pad:2 * h_pad]
            o_g = sig[:, 2 * h_pad:3 * h_pad]
            g_g = jnp.tanh(gates[:, 3 * h_pad:])
            c_new = f_g * c_prev + i_g * g_g
            h_new = o_g * jnp.tanh(c_new)
            return (h_new, c_new)

        return lax.fori_loop(0, length, step, carry,
                             unroll=min(inner_unroll, length))

    # Prologue: projection for chunk 0.
    project(0, 0)

    carry = (jnp.zeros((tb, h_pad), jnp.float32),   # h0
             jnp.zeros((tb, h_pad), jnp.float32))   # c0

    # Static loop over a small number of chunks; only h/c (one vreg each at
    # H_pad=128) are live across iterations.
    for ck in range(n_chunks):
        slot = (ck % 2) if n_slots > 1 else 0
        if ck + 1 < n_chunks:
            # Issue the next chunk's MXU projection before this chunk's serially
            # latency-bound recurrence so the two can overlap.
            project(ck + 1, 1 - slot)
        carry = run_chunk(ck, slot, carry)

    hout_ref[0] = carry[0].astype(hout_ref.dtype)


# ----------------------------------------------------------------------------
# Wrapper helpers
# ----------------------------------------------------------------------------
def _round_up(x, m):
    return ((x + m - 1) // m) * m


def _pad_axis(x, target, axis):
    pad = target - x.shape[axis]
    if pad == 0:
        return x
    widths = [(0, 0)] * x.ndim
    widths[axis] = (0, pad)
    return jnp.pad(x, widths)


_GATE_ORDER = (0, 1, 3, 2)   # [i, f, g, o] (PyTorch) -> [i, f, o, g] (kernel)


def _pack_lstm_weights(lstm_params, d_pad, h_pad):
    """Reorder gates to [i,f,o,g], pad per-gate to (d_pad, h_pad), stack, cast."""
    wihs, whhs, biases = [], [], []
    for w_ih, w_hh, bias in lstm_params:
        d_in = w_ih.shape[0]
        h = w_hh.shape[0]
        wih = w_ih.reshape(d_in, 4, h)[:, _GATE_ORDER, :]
        wih = _pad_axis(_pad_axis(wih, h_pad, 2), d_pad, 0)
        wihs.append(wih.reshape(d_pad, 4 * h_pad))
        whh = w_hh.reshape(h, 4, h)[:, _GATE_ORDER, :]
        whh = _pad_axis(_pad_axis(whh, h_pad, 2), h_pad, 0)
        whhs.append(whh.reshape(h_pad, 4 * h_pad))
        b = _pad_axis(bias.reshape(4, h)[_GATE_ORDER, :], h_pad, 1)
        biases.append(b.reshape(1, 4 * h_pad))
    return (jnp.stack(wihs).astype(jnp.bfloat16),
            jnp.stack(whhs).astype(jnp.bfloat16),
            jnp.stack(biases).astype(jnp.float32))


def fused_lstm_last_hidden(ctx_list, lstm_params, *, batch_tile=None,
                           t_chunk=16, inner_unroll=8):
    """ctx_list: list of (B, S, D_m) f32 sequences (one per modality).
    lstm_params: matching list of (W_ih, W_hh, bias). Returns list of (B, H_m)."""
    n_mod = len(ctx_list)
    b, s = ctx_list[0].shape[0], ctx_list[0].shape[1]
    if any(c.shape[0] != b or c.shape[1] != s for c in ctx_list):
        raise ValueError("all modalities must share (batch, seq_len)")
    hidden_sizes = [int(w_hh.shape[0]) for (_, w_hh, _) in lstm_params]

    # Batch tiling: keep the recurrence carries register-resident.
    if batch_tile is None:
        batch_tile = 8 if b <= 16 else (16 if b <= 64 else 32)
    tb = batch_tile
    b_pad = _round_up(b, tb)
    n_bt = b_pad // tb

    tc = max(1, min(t_chunk, s))
    n_chunks = -(-s // tc)
    n_slots = 2 if n_chunks > 1 else 1

    # Group modalities that share the same padded (D, H) so each pallas_call is
    # sized to its modality instead of the global max.
    groups = {}
    for mi, (c, h) in enumerate(zip(ctx_list, hidden_sizes)):
        key = (_round_up(max(c.shape[-1], 1), 128), _round_up(max(h, 1), 128))
        groups.setdefault(key, []).append(mi)

    results = [None] * n_mod
    for (d_pad, h_pad), idxs in groups.items():
        m = len(idxs)
        # Time-major, padded, stacked inputs written into one preallocated slab.
        x_all = jnp.zeros((m, s, b_pad, d_pad), jnp.bfloat16)
        for gi, mi in enumerate(idxs):
            xt = jnp.transpose(ctx_list[mi], (1, 0, 2)).astype(jnp.bfloat16)
            x_all = x_all.at[gi, :, :b, :xt.shape[-1]].set(xt)

        wih_all, whh_all, b_all = _pack_lstm_weights(
            [lstm_params[mi] for mi in idxs], d_pad, h_pad)

        # Explicit VMEM budget (double-buffered blocks + scratch + margin).
        vmem_bytes = (
            2 * (s * tb * d_pad * 2)               # x block (bf16)
            + 2 * (d_pad * 4 * h_pad * 2)          # W_ih (bf16)
            + 2 * (h_pad * 4 * h_pad * 2)          # W_hh (bf16)
            + 2 * (4 * h_pad * 4)                  # bias (f32)
            + 2 * (tb * h_pad * 4)                 # out (f32)
            + n_slots * tc * tb * 4 * h_pad * 4    # g_scr (f32)
        )
        vmem_limit = int(min(vmem_bytes + (8 << 20), 128 << 20))

        kernel = functools.partial(
            _lstm_group_kernel, t_chunk=tc, inner_unroll=inner_unroll)

        out = pl.pallas_call(
            kernel,
            out_shape=jax.ShapeDtypeStruct((m, b_pad, h_pad), jnp.float32),
            grid_spec=pltpu.PrefetchScalarGridSpec(
                num_scalar_prefetch=0,
                grid=(m, n_bt),                    # modality x batch tiles
                in_specs=[
                    pl.BlockSpec((1, s, tb, d_pad), lambda mi_, bt: (mi_, 0, bt, 0)),
                    pl.BlockSpec((1, d_pad, 4 * h_pad), lambda mi_, bt: (mi_, 0, 0)),
                    pl.BlockSpec((1, h_pad, 4 * h_pad), lambda mi_, bt: (mi_, 0, 0)),
                    pl.BlockSpec((1, 1, 4 * h_pad), lambda mi_, bt: (mi_, 0, 0)),
                ],
                out_specs=pl.BlockSpec((1, tb, h_pad), lambda mi_, bt: (mi_, bt, 0)),
                scratch_shapes=[
                    pltpu.VMEM((n_slots, tc, tb, 4 * h_pad), jnp.float32),
                ],
            ),
            compiler_params=pltpu.CompilerParams(
                dimension_semantics=("parallel", "parallel"),
                vmem_limit_bytes=vmem_limit,
            ),
        )(x_all, wih_all, whh_all, b_all)

        for gi, mi in enumerate(idxs):
            results[mi] = out[gi, :b, :hidden_sizes[mi]]
    return results


# ----------------------------------------------------------------------------
# Unimodal_Context forward (glue in plain JAX, LSTM hot path in Pallas)
# ----------------------------------------------------------------------------
def init_lstm_params(key, d_in, hidden):
    """Deterministic init matching nn.LSTM shapes (uniform +-1/sqrt(H))."""
    k1, k2, k3, k4 = jax.random.split(key, 4)
    scale = 1.0 / jnp.sqrt(hidden)
    w_ih = jax.random.uniform(k1, (d_in, 4 * hidden), jnp.float32, -scale, scale)
    w_hh = jax.random.uniform(k2, (hidden, 4 * hidden), jnp.float32, -scale, scale)
    b_ih = jax.random.uniform(k3, (4 * hidden,), jnp.float32, -scale, scale)
    b_hh = jax.random.uniform(k4, (4 * hidden,), jnp.float32, -scale, scale)
    return w_ih, w_hh, b_ih + b_hh


def _split_contexts(X_context, params, config):
    ob, cs, sl, nf = X_context.shape
    d_text_idx, d_audio, d_video = config["input_dims"]
    X = X_context.reshape(ob * cs, sl, nf)

    # Word-embedding lookup (gather glue; indices stored as floats per the ref).
    idx = X[:, :, :d_text_idx].astype(jnp.int32)             # (B, S, 1)
    text_ctx = params["embed"][idx].squeeze(-2)              # (B, S, E)
    audio_ctx = X[:, :, d_text_idx:d_text_idx + d_audio]     # (B, S, Da)
    video_ctx = X[:, :, d_text_idx + d_audio:]               # (B, S, Dv)

    if not config["use_context_text"]:
        text_ctx = jnp.zeros_like(text_ctx)
    if not config["use_context_audio"]:
        audio_ctx = jnp.zeros_like(audio_ctx)
    if not config["use_punchline_video"]:
        video_ctx = jnp.zeros_like(video_ctx)

    soi = config.get("selectively_omitted_index", -1)
    if soi != -1:
        entry = config["selective_audio_visual_feature_omission"][soi]
        omit = jnp.asarray(entry["indices"], dtype=jnp.int32)
        if entry["modality"] == "audio":
            mask = jnp.ones((audio_ctx.shape[-1],), jnp.float32).at[omit].set(0.0)
            audio_ctx = audio_ctx * mask
        elif entry["modality"] == "video":
            mask = jnp.ones((video_ctx.shape[-1],), jnp.float32).at[omit].set(0.0)
            video_ctx = video_ctx * mask
    return text_ctx, audio_ctx, video_ctx


def unimodal_context_forward(X_context, params, config):
    """X_context: (old_batch, context, seq, num_feats) float32.
    Returns (text_res, audio_res, video_res), each (old_batch, context, H_x)."""
    ob, cs = X_context.shape[0], X_context.shape[1]
    text_ctx, audio_ctx, video_ctx = _split_contexts(X_context, params, config)

    ht, ha, hv = fused_lstm_last_hidden(
        [text_ctx, audio_ctx, video_ctx],
        [params["text_lstm"], params["audio_lstm"], params["video_lstm"]],
    )

    return (ht.reshape(ob, cs, -1),
            ha.reshape(ob, cs, -1),
            hv.reshape(ob, cs, -1))


# ----------------------------------------------------------------------------
# Pure-JAX reference (for correctness check only)
# ----------------------------------------------------------------------------
def _lstm_last_hidden_ref(x, lstm_param):
    w_ih, w_hh, bias = lstm_param
    h_dim = w_hh.shape[0]
    h = jnp.zeros((x.shape[0], h_dim), jnp.float32)
    c = jnp.zeros_like(h)
    for t in range(x.shape[1]):
        gates = x[:, t] @ w_ih + h @ w_hh + bias
        i = jax.nn.sigmoid(gates[:, :h_dim])
        f = jax.nn.sigmoid(gates[:, h_dim:2 * h_dim])
        g = jnp.tanh(gates[:, 2 * h_dim:3 * h_dim])
        o = jax.nn.sigmoid(gates[:, 3 * h_dim:])
        c = f * c + i * g
        h = o * jnp.tanh(c)
    return h


def unimodal_context_forward_ref(X_context, params, config):
    ob, cs = X_context.shape[0], X_context.shape[1]
    text_ctx, audio_ctx, video_ctx = _split_contexts(X_context, params, config)
    ht = _lstm_last_hidden_ref(text_ctx, params["text_lstm"])
    ha = _lstm_last_hidden_ref(audio_ctx, params["audio_lstm"])
    hv = _lstm_last_hidden_ref(video_ctx, params["video_lstm"])
    return (ht.reshape(ob, cs, -1), ha.reshape(ob, cs, -1), hv.reshape(ob, cs, -1))


if __name__ == "__main__":
    # Small synthetic config consistent with the module's forward.
    old_batch, context_size, seq_len = 2, 2, 8
    input_dims = [1, 8, 16]                     # [text index cols, audio, video]
    emb_dim, vocab = 32, 50
    h_text, h_audio, h_video = 32, 16, 16

    config = {
        "input_dims": input_dims,
        "use_context_text": True,
        "use_context_audio": True,
        "use_punchline_video": True,
        "selectively_omitted_index": -1,
        "selective_audio_visual_feature_omission": [],
    }

    key = jax.random.PRNGKey(0)
    k_emb, k_t, k_a, k_v, k_idx, k_av = jax.random.split(key, 6)

    params = {
        "embed": jax.random.normal(k_emb, (vocab, emb_dim), jnp.float32),
        "text_lstm": init_lstm_params(k_t, emb_dim, h_text),
        "audio_lstm": init_lstm_params(k_a, input_dims[1], h_audio),
        "video_lstm": init_lstm_params(k_v, input_dims[2], h_video),
    }

    # Build X_context: first column holds word indices (as floats), rest features.
    text_idx = jax.random.randint(
        k_idx, (old_batch, context_size, seq_len, input_dims[0]), 0, vocab
    ).astype(jnp.float32)
    av_feats = jax.random.normal(
        k_av, (old_batch, context_size, seq_len, input_dims[1] + input_dims[2]),
        jnp.float32)
    X_context = jnp.concatenate([text_idx, av_feats], axis=-1)

    fwd = jax.jit(functools.partial(unimodal_context_forward, config=config))
    text_res, audio_res, video_res = fwd(X_context, params)
    jax.block_until_ready((text_res, audio_res, video_res))

    assert text_res.shape == (old_batch, context_size, h_text)
    assert audio_res.shape == (old_batch, context_size, h_audio)
    assert video_res.shape == (old_batch, context_size, h_video)
    assert bool(jnp.all(jnp.isfinite(text_res)))
    assert bool(jnp.all(jnp.isfinite(audio_res)))
    assert bool(jnp.all(jnp.isfinite(video_res)))

    # Correctness vs. pure-JAX f32 reference (bf16 MXU operands -> small drift).
    ref_t, ref_a, ref_v = unimodal_context_forward_ref(X_context, params, config)
    for got, ref in ((text_res, ref_t), (audio_res, ref_a), (video_res, ref_v)):
        err = float(jnp.max(jnp.abs(got - ref)))
        assert err < 0.1, f"max abs error {err} vs reference"

    print("KERNEL_OK")
</pallas_src>

<mosaic_0001>
module attributes {stable_mosaic.version = 11 : i64} {
  func.func @_lstm_group_kernel(%arg0: i32, %arg1: i32, %arg2: memref<1x8x8x128xbf16, #tpu.memory_space<vmem>>, %arg3: memref<1x128x512xbf16, #tpu.memory_space<vmem>>, %arg4: memref<1x128x512xbf16, #tpu.memory_space<vmem>>, %arg5: memref<1x1x512xf32, #tpu.memory_space<vmem>>, %arg6: memref<1x8x128xf32, #tpu.memory_space<vmem>>, %arg7: memref<1x8x8x512xf32, #tpu.memory_space<vmem>>) attributes {dimension_semantics = [#tpu.dimension_semantics<parallel>, #tpu.dimension_semantics<parallel>], iteration_bounds = array<i64: 3, 1>, scalar_prefetch = 0 : i64, scratch_operands = 1 : i64, tpu.core_type = #tpu.core_type<tc>, window_params = [{transform_indices = @transform_0, window_bounds = array<i64: 1, 8, 8, 128>}, {transform_indices = @transform_1, window_bounds = array<i64: 1, 128, 512>}, {transform_indices = @transform_2, window_bounds = array<i64: 1, 128, 512>}, {transform_indices = @transform_3, window_bounds = array<i64: 1, 1, 512>}, {transform_indices = @transform_4, window_bounds = array<i64: 1, 8, 128>}]} {
    %c0 = arith.constant 0 : index
    %c0_0 = arith.constant 0 : index
    %c0_1 = arith.constant 0 : index
    %c0_2 = arith.constant 0 : index
    %0 = vector.load %arg2[%c0, %c0_0, %c0_1, %c0_2] : memref<1x8x8x128xbf16, #tpu.memory_space<vmem>>, vector<1x8x8x128xbf16>
    %1 = vector.shape_cast %0 : vector<1x8x8x128xbf16> to vector<8x8x128xbf16>
    %2 = vector.shape_cast %1 : vector<8x8x128xbf16> to vector<64x128xbf16>
    %c0_3 = arith.constant 0 : index
    %c0_4 = arith.constant 0 : index
    %c0_5 = arith.constant 0 : index
    %3 = vector.load %arg3[%c0_3, %c0_4, %c0_5] : memref<1x128x512xbf16, #tpu.memory_space<vmem>>, vector<1x128x512xbf16>
    %4 = vector.shape_cast %3 : vector<1x128x512xbf16> to vector<128x512xbf16>
    %cst = arith.constant dense<0.000000e+00> : vector<64x512xf32>
    %5 = tpu.matmul %2, %4, %cst {dimension_numbers = #tpu.dot_dimension_numbers<[1], [0], [0], [1], [0, 0, 1, 1], [], []>} : vector<64x128xbf16>, vector<128x512xbf16>, vector<64x512xf32> -> vector<64x512xf32>
    %c0_6 = arith.constant 0 : index
    %c0_7 = arith.constant 0 : index
    %c0_8 = arith.constant 0 : index
    %6 = vector.load %arg5[%c0_6, %c0_7, %c0_8] : memref<1x1x512xf32, #tpu.memory_space<vmem>>, vector<1x1x512xf32>
    %7 = vector.shape_cast %6 : vector<1x1x512xf32> to vector<1x512xf32>
    %8 = vector.broadcast %7 : vector<1x512xf32> to vector<64x512xf32>
    %9 = arith.addf %5, %8 : vector<64x512xf32>
    %10 = vector.shape_cast %9 : vector<64x512xf32> to vector<8x8x512xf32>
    %c0_9 = arith.constant 0 : index
    %c0_10 = arith.constant 0 : index
    %c0_11 = arith.constant 0 : index
    %c0_12 = arith.constant 0 : index
    %11 = vector.load %arg7[%c0_9, %c0_10, %c0_11, %c0_12] : memref<1x8x8x512xf32, #tpu.memory_space<vmem>>, vector<1x8x8x512xf32>
    %12 = vector.shape_cast %11 : vector<1x8x8x512xf32> to vector<8x8x512xf32>
    %13 = vector.shape_cast %10 : vector<8x8x512xf32> to vector<1x8x8x512xf32>
    tpu.vector_store %arg7[%c0_9, %c0_10, %c0_11, %c0_12], %13 {strides = array<i32>} : memref<1x8x8x512xf32, #tpu.memory_space<vmem>>, vector<1x8x8x512xf32>,
    %cst_13 = arith.constant 0.000000e+00 : f32
    %14 = vector.broadcast %cst_13 : f32 to vector<8x128xf32>
    %cst_14 = arith.constant 0.000000e+00 : f32
    %15 = vector.broadcast %cst_14 : f32 to vector<8x128xf32>
    %c0_i32 = arith.constant 0 : i32
    %c0_15 = arith.constant 0 : index
    %16 = arith.index_cast %c0_i32 : i32 to index
    %c0_16 = arith.constant 0 : index
    %c0_17 = arith.constant 0 : index
    %17 = vector.load %arg7[%c0_15, %16, %c0_16, %c0_17] : memref<1x8x8x512xf32, #tpu.memory_space<vmem>>, vector<1x1x8x512xf32>
    %18 = vector.shape_cast %17 : vector<1x1x8x512xf32> to vector<8x512xf32>
    %19 = arith.truncf %14 : vector<8x128xf32> to vector<8x128xbf16>
    %c0_18 = arith.constant 0 : index
    %c0_19 = arith.constant 0 : index
    %c0_20 = arith.constant 0 : index
    %20 = vector.load %arg4[%c0_18, %c0_19, %c0_20] : memref<1x128x512xbf16, #tpu.memory_space<vmem>>, vector<1x128x512xbf16>
    %21 = vector.shape_cast %20 : vector<1x128x512xbf16> to vector<128x512xbf16>
    %cst_21 = arith.constant dense<0.000000e+00> : vector<8x512xf32>
    %22 = tpu.matmul %19, %21, %cst_21 {dimension_numbers = #tpu.dot_dimension_numbers<[1], [0], [0], [1], [0, 0, 1, 1], [], []>} : vector<8x128xbf16>, vector<128x512xbf16>, vector<8x512xf32> -> vector<8x512xf32>
    %23 = arith.addf %18, %22 : vector<8x512xf32>
    %24 = vector.extract_strided_slice %23 {offsets = [0, 0], sizes = [8, 384], strides = [1, 1]} : vector<8x512xf32> to vector<8x384xf32>
    %25 = arith.negf %24 : vector<8x384xf32>
    %26 = math.exp %25 : vector<8x384xf32>
    %cst_22 = arith.constant 1.000000e+00 : f32
    %27 = vector.broadcast %cst_22 : f32 to vector<8x384xf32>
    %28 = arith.addf %27, %26 : vector<8x384xf32>
    %29 = arith.divf %27, %28 : vector<8x384xf32>
    %30 = vector.extract_strided_slice %29 {offsets = [0, 0], sizes = [8, 128], strides = [1, 1]} : vector<8x384xf32> to vector<8x128xf32>
    %31 = vector.extract_strided_slice %29 {offsets = [0, 128], sizes = [8, 128], strides = [1, 1]} : vector<8x384xf32> to vector<8x128xf32>
    %32 = vector.extract_strided_slice %29 {offsets = [0, 256], sizes = [8, 128], strides = [1, 1]} : vector<8x384xf32> to vector<8x128xf32>
    %33 = vector.extract_strided_slice %23 {offsets = [0, 384], sizes = [8, 128], strides = [1, 1]} : vector<8x512xf32> to vector<8x128xf32>
    %34 = math.tanh %33 : vector<8x128xf32>
    %35 = arith.mulf %31, %15 : vector<8x128xf32>
    %36 = arith.mulf %30, %34 : vector<8x128xf32>
    %37 = arith.addf %35, %36 : vector<8x128xf32>
    %38 = math.tanh %37 : vector<8x128xf32>
    %39 = arith.mulf %32, %38 : vector<8x128xf32>
    %c1_i32 = arith.constant 1 : i32
    %c0_23 = arith.constant 0 : index
    %40 = arith.index_cast %c1_i32 : i32 to index
    %c0_24 = arith.constant 0 : index
    %c0_25 = arith.constant 0 : index
    %41 = vector.load %arg7[%c0_23, %40, %c0_24, %c0_25] : memref<1x8x8x512xf32, #tpu.memory_space<vmem>>, vector<1x1x8x512xf32>
    %42 = vector.shape_cast %41 : vector<1x1x8x512xf32> to vector<8x512xf32>
    %43 = arith.truncf %39 : vector<8x128xf32> to vector<8x128xbf16>
    %c0_26 = arith.constant 0 : index
    %c0_27 = arith.constant 0 : index
    %c0_28 = arith.constant 0 : index
    %44 = vector.load %arg4[%c0_26, %c0_27, %c0_28] : memref<1x128x512xbf16, #tpu.memory_space<vmem>>, vector<1x128x512xbf16>
    %45 = vector.shape_cast %44 : vector<1x128x512xbf16> to vector<128x512xbf16>
    %cst_29 = arith.constant dense<0.000000e+00> : vector<8x512xf32>
    %46 = tpu.matmul %43, %45, %cst_29 {dimension_numbers = #tpu.dot_dimension_numbers<[1], [0], [0], [1], [0, 0, 1, 1], [], []>} : vector<8x128xbf16>, vector<128x512xbf16>, vector<8x512xf32> -> vector<8x512xf32>
    %47 = arith.addf %42, %46 : vector<8x512xf32>
    %48 = vector.extract_strided_slice %47 {offsets = [0, 0], sizes = [8, 384], strides = [1, 1]} : vector<8x512xf32> to vector<8x384xf32>
    %49 = arith.negf %48 : vector<8x384xf32>
    %50 = math.exp %49 : vector<8x384xf32>
    %cst_30 = arith.constant 1.000000e+00 : f32
    %51 = vector.broadcast %cst_30 : f32 to vector<8x384xf32>
    %52 = arith.addf %51, %50 : vector<8x384xf32>
    %53 = arith.divf %51, %52 : vector<8x384xf32>
    %54 = vector.extract_strided_slice %53 {offsets = [0, 0], sizes = [8, 128], strides = [1, 1]} : vector<8x384xf32> to vector<8x128xf32>
    %55 = vector.extract_strided_slice %53 {offsets = [0, 128], sizes = [8, 128], strides = [1, 1]} : vector<8x384xf32> to vector<8x128xf32>
    %56 = vector.extract_strided_slice %53 {offsets = [0, 256], sizes = [8, 128], strides = [1, 1]} : vector<8x384xf32> to vector<8x128xf32>
    %57 = vector.extract_strided_slice %47 {offsets = [0, 384], sizes = [8, 128], strides = [1, 1]} : vector<8x512xf32> to vector<8x128xf32>
    %58 = math.tanh %57 : vector<8x128xf32>
    %59 = arith.mulf %55, %37 : vector<8x128xf32>
    %60 = arith.mulf %54, %58 : vector<8x128xf32>
    %61 = arith.addf %59, %60 : vector<8x128xf32>
    %62 = math.tanh %61 : vector<8x128xf32>
    %63 = arith.mulf %56, %62 : vector<8x128xf32>
    %c2_i32 = arith.constant 2 : i32
    %c0_31 = arith.constant 0 : index
    %64 = arith.index_cast %c2_i32 : i32 to index
    %c0_32 = arith.constant 0 : index
    %c0_33 = arith.constant 0 : index
    %65 = vector.load %arg7[%c0_31, %64, %c0_32, %c0_33] : memref<1x8x8x512xf32, #tpu.memory_space<vmem>>, vector<1x1x8x512xf32>
    %66 = vector.shape_cast %65 : vector<1x1x8x512xf32> to vector<8x512xf32>
    %67 = arith.truncf %63 : vector<8x128xf32> to vector<8x128xbf16>
    %c0_34 = arith.constant 0 : index
    %c0_35 = arith.constant 0 : index
    %c0_36 = arith.constant 0 : index
    %68 = vector.load %arg4[%c0_34, %c0_35, %c0_36] : memref<1x128x512xbf16, #tpu.memory_space<vmem>>, vector<1x128x512xbf16>
    %69 = vector.shape_cast %68 : vector<1x128x512xbf16> to vector<128x512xbf16>
    %cst_37 = arith.constant dense<0.000000e+00> : vector<8x512xf32>
    %70 = tpu.matmul %67, %69, %cst_37 {dimension_numbers = #tpu.dot_dimension_numbers<[1], [0], [0], [1], [0, 0, 1, 1], [], []>} : vector<8x128xbf16>, vector<128x512xbf16>, vector<8x512xf32> -> vector<8x512xf32>
    %71 = arith.addf %66, %70 : vector<8x512xf32>
    %72 = vector.extract_strided_slice %71 {offsets = [0, 0], sizes = [8, 384], strides = [1, 1]} : vector<8x512xf32> to vector<8x384xf32>
    %73 = arith.negf %72 : vector<8x384xf32>
    %74 = math.exp %73 : vector<8x384xf32>
    %cst_38 = arith.constant 1.000000e+00 : f32
    %75 = vector.broadcast %cst_38 : f32 to vector<8x384xf32>
    %76 = arith.addf %75, %74 : vector<8x384xf32>
    %77 = arith.divf %75, %76 : vector<8x384xf32>
    %78 = vector.extract_strided_slice %77 {offsets = [0, 0], sizes = [8, 128], strides = [1, 1]} : vector<8x384xf32> to vector<8x128xf32>
    %79 = vector.extract_strided_slice %77 {offsets = [0, 128], sizes = [8, 128], strides = [1, 1]} : vector<8x384xf32> to vector<8x128xf32>
    %80 = vector.extract_strided_slice %77 {offsets = [0, 256], sizes = [8, 128], strides = [1, 1]} : vector<8x384xf32> to vector<8x128xf32>
    %81 = vector.extract_strided_slice %71 {offsets = [0, 384], sizes = [8, 128], strides = [1, 1]} : vector<8x512xf32> to vector<8x128xf32>
    %82 = math.tanh %81 : vector<8x128xf32>
    %83 = arith.mulf %79, %61 : vector<8x128xf32>
    %84 = arith.mulf %78, %82 : vector<8x128xf32>
    %85 = arith.addf %83, %84 : vector<8x128xf32>
    %86 = math.tanh %85 : vector<8x128xf32>
    %87 = arith.mulf %80, %86 : vector<8x128xf32>
    %c3_i32 = arith.constant 3 : i32
    %c0_39 = arith.constant 0 : index
    %88 = arith.index_cast %c3_i32 : i32 to index
    %c0_40 = arith.constant 0 : index
    %c0_41 = arith.constant 0 : index
    %89 = vector.load %arg7[%c0_39, %88, %c0_40, %c0_41] : memref<1x8x8x512xf32, #tpu.memory_space<vmem>>, vector<1x1x8x512xf32>
    %90 = vector.shape_cast %89 : vector<1x1x8x512xf32> to vector<8x512xf32>
    %91 = arith.truncf %87 : vector<8x128xf32> to vector<8x128xbf16>
    %c0_42 = arith.constant 0 : index
    %c0_43 = arith.constant 0 : index
    %c0_44 = arith.constant 0 : index
    %92 = vector.load %arg4[%c0_42, %c0_43, %c0_44] : memref<1x128x512xbf16, #tpu.memory_space<vmem>>, vector<1x128x512xbf16>
    %93 = vector.shape_cast %92 : vector<1x128x512xbf16> to vector<128x512xbf16>
    %cst_45 = arith.constant dense<0.000000e+00> : vector<8x512xf32>
    %94 = tpu.matmul %91, %93, %cst_45 {dimension_numbers = #tpu.dot_dimension_numbers<[1], [0], [0], [1], [0, 0, 1, 1], [], []>} : vector<8x128xbf16>, vector<128x512xbf16>, vector<8x512xf32> -> vector<8x512xf32>
    %95 = arith.addf %90, %94 : vector<8x512xf32>
    %96 = vector.extract_strided_slice %95 {offsets = [0, 0], sizes = [8, 384], strides = [1, 1]} : vector<8x512xf32> to vector<8x384xf32>
    %97 = arith.negf %96 : vector<8x384xf32>
    %98 = math.exp %97 : vector<8x384xf32>
    %cst_46 = arith.constant 1.000000e+00 : f32
    %99 = vector.broadcast %cst_46 : f32 to vector<8x384xf32>
    %100 = arith.addf %99, %98 : vector<8x384xf32>
    %101 = arith.divf %99, %100 : vector<8x384xf32>
    %102 = vector.extract_strided_slice %101 {offsets = [0, 0], sizes = [8, 128], strides = [1, 1]} : vector<8x384xf32> to vector<8x128xf32>
    %103 = vector.extract_strided_slice %101 {offsets = [0, 128], sizes = [8, 128], strides = [1, 1]} : vector<8x384xf32> to vector<8x128xf32>
    %104 = vector.extract_strided_slice %101 {offsets = [0, 256], sizes = [8, 128], strides = [1, 1]} : vector<8x384xf32> to vector<8x128xf32>
    %105 = vector.extract_strided_slice %95 {offsets = [0, 384], sizes = [8, 128], strides = [1, 1]} : vector<8x512xf32> to vector<8x128xf32>
    %106 = math.tanh %105 : vector<8x128xf32>
    %107 = arith.mulf %103, %85 : vector<8x128xf32>
    %108 = arith.mulf %102, %106 : vector<8x128xf32>
    %109 = arith.addf %107, %108 : vector<8x128xf32>
    %110 = math.tanh %109 : vector<8x128xf32>
    %111 = arith.mulf %104, %110 : vector<8x128xf32>
    %c4_i32 = arith.constant 4 : i32
    %c0_47 = arith.constant 0 : index
    %112 = arith.index_cast %c4_i32 : i32 to index
    %c0_48 = arith.constant 0 : index
    %c0_49 = arith.constant 0 : index
    %113 = vector.load %arg7[%c0_47, %112, %c0_48, %c0_49] : memref<1x8x8x512xf32, #tpu.memory_space<vmem>>, vector<1x1x8x512xf32>
    %114 = vector.shape_cast %113 : vector<1x1x8x512xf32> to vector<8x512xf32>
    %115 = arith.truncf %111 : vector<8x128xf32> to vector<8x128xbf16>
    %c0_50 = arith.constant 0 : index
    %c0_51 = arith.constant 0 : index
    %c0_52 = arith.constant 0 : index
    %116 = vector.load %arg4[%c0_50, %c0_51, %c0_52] : memref<1x128x512xbf16, #tpu.memory_space<vmem>>, vector<1x128x512xbf16>
    %117 = vector.shape_cast %116 : vector<1x128x512xbf16> to vector<128x512xbf16>
    %cst_53 = arith.constant dense<0.000000e+00> : vector<8x512xf32>
    %118 = tpu.matmul %115, %117, %cst_53 {dimension_numbers = #tpu.dot_dimension_numbers<[1], [0], [0], [1], [0, 0, 1, 1], [], []>} : vector<8x128xbf16>, vector<128x512xbf16>, vector<8x512xf32> -> vector<8x512xf32>
    %119 = arith.addf %114, %118 : vector<8x512xf32>
    %120 = vector.extract_strided_slice %119 {offsets = [0, 0], sizes = [8, 384], strides = [1, 1]} : vector<8x512xf32> to vector<8x384xf32>
    %121 = arith.negf %120 : vector<8x384xf32>
    %122 = math.exp %121 : vector<8x384xf32>
    %cst_54 = arith.constant 1.000000e+00 : f32
    %123 = vector.broadcast %cst_54 : f32 to vector<8x384xf32>
    %124 = arith.addf %123, %122 : vector<8x384xf32>
    %125 = arith.divf %123, %124 : vector<8x384xf32>
    %126 = vector.extract_strided_slice %125 {offsets = [0, 0], sizes = [8, 128], strides = [1, 1]} : vector<8x384xf32> to vector<8x128xf32>
    %127 = vector.extract_strided_slice %125 {offsets = [0, 128], sizes = [8, 128], strides = [1, 1]} : vector<8x384xf32> to vector<8x128xf32>
    %128 = vector.extract_strided_slice %125 {offsets = [0, 256], sizes = [8, 128], strides = [1, 1]} : vector<8x384xf32> to vector<8x128xf32>
    %129 = vector.extract_strided_slice %119 {offsets = [0, 384], sizes = [8, 128], strides = [1, 1]} : vector<8x512xf32> to vector<8x128xf32>
    %130 = math.tanh %129 : vector<8x128xf32>
    %131 = arith.mulf %127, %109 : vector<8x128xf32>
    %132 = arith.mulf %126, %130 : vector<8x128xf32>
    %133 = arith.addf %131, %132 : vector<8x128xf32>
    %134 = math.tanh %133 : vector<8x128xf32>
    %135 = arith.mulf %128, %134 : vector<8x128xf32>
    %c5_i32 = arith.constant 5 : i32
    %c0_55 = arith.constant 0 : index
    %136 = arith.index_cast %c5_i32 : i32 to index
    %c0_56 = arith.constant 0 : index
    %c0_57 = arith.constant 0 : index
    %137 = vector.load %arg7[%c0_55, %136, %c0_56, %c0_57] : memref<1x8x8x512xf32, #tpu.memory_space<vmem>>, vector<1x1x8x512xf32>
    %138 = vector.shape_cast %137 : vector<1x1x8x512xf32> to vector<8x512xf32>
    %139 = arith.truncf %135 : vector<8x128xf32> to vector<8x128xbf16>
    %c0_58 = arith.constant 0 : index
    %c0_59 = arith.constant 0 : index
    %c0_60 = arith.constant 0 : index
    %140 = vector.load %arg4[%c0_58, %c0_59, %c0_60] : memref<1x128x512xbf16, #tpu.memory_space<vmem>>, vector<1x128x512xbf16>
    %141 = vector.shape_cast %140 : vector<1x128x512xbf16> to vector<128x512xbf16>
    %cst_61 = arith.constant dense<0.000000e+00> : vector<8x512xf32>
    %142 = tpu.matmul %139, %141, %cst_61 {dimension_numbers = #tpu.dot_dimension_numbers<[1], [0], [0], [1], [0, 0, 1, 1], [], []>} : vector<8x128xbf16>, vector<128x512xbf16>, vector<8x512xf32> -> vector<8x512xf32>
    %143 = arith.addf %138, %142 : vector<8x512xf32>
    %144 = vector.extract_strided_slice %143 {offsets = [0, 0], sizes = [8, 384], strides = [1, 1]} : vector<8x512xf32> to vector<8x384xf32>
    %145 = arith.negf %144 : vector<8x384xf32>
    %146 = math.exp %145 : vector<8x384xf32>
    %cst_62 = arith.constant 1.000000e+00 : f32
    %147 = vector.broadcast %cst_62 : f32 to vector<8x384xf32>
    %148 = arith.addf %147, %146 : vector<8x384xf32>
    %149 = arith.divf %147, %148 : vector<8x384xf32>
    %150 = vector.extract_strided_slice %149 {offsets = [0, 0], sizes = [8, 128], strides = [1, 1]} : vector<8x384xf32> to vector<8x128xf32>
    %151 = vector.extract_strided_slice %149 {offsets = [0, 128], sizes = [8, 128], strides = [1, 1]} : vector<8x384xf32> to vector<8x128xf32>
    %152 = vector.extract_strided_slice %149 {offsets = [0, 256], sizes = [8, 128], strides = [1, 1]} : vector<8x384xf32> to vector<8x128xf32>
    %153 = vector.extract_strided_slice %143 {offsets = [0, 384], sizes = [8, 128], strides = [1, 1]} : vector<8x512xf32> to vector<8x128xf32>
    %154 = math.tanh %153 : vector<8x128xf32>
    %155 = arith.mulf %151, %133 : vector<8x128xf32>
    %156 = arith.mulf %150, %154 : vector<8x128xf32>
    %157 = arith.addf %155, %156 : vector<8x128xf32>
    %158 = math.tanh %157 : vector<8x128xf32>
    %159 = arith.mulf %152, %158 : vector<8x128xf32>
    %c6_i32 = arith.constant 6 : i32
    %c0_63 = arith.constant 0 : index
    %160 = arith.index_cast %c6_i32 : i32 to index
    %c0_64 = arith.constant 0 : index
    %c0_65 = arith.constant 0 : index
    %161 = vector.load %arg7[%c0_63, %160, %c0_64, %c0_65] : memref<1x8x8x512xf32, #tpu.memory_space<vmem>>, vector<1x1x8x512xf32>
    %162 = vector.shape_cast %161 : vector<1x1x8x512xf32> to vector<8x512xf32>
    %163 = arith.truncf %159 : vector<8x128xf32> to vector<8x128xbf16>
    %c0_66 = arith.constant 0 : index
    %c0_67 = arith.constant 0 : index
    %c0_68 = arith.constant 0 : index
    %164 = vector.load %arg4[%c0_66, %c0_67, %c0_68] : memref<1x128x512xbf16, #tpu.memory_space<vmem>>, vector<1x128x512xbf16>
    %165 = vector.shape_cast %164 : vector<1x128x512xbf16> to vector<128x512xbf16>
    %cst_69 = arith.constant dense<0.000000e+00> : vector<8x512xf32>
    %166 = tpu.matmul %163, %165, %cst_69 {dimension_numbers = #tpu.dot_dimension_numbers<[1], [0], [0], [1], [0, 0, 1, 1], [], []>} : vector<8x128xbf16>, vector<128x512xbf16>, vector<8x512xf32> -> vector<8x512xf32>
    %167 = arith.addf %162, %166 : vector<8x512xf32>
    %168 = vector.extract_strided_slice %167 {offsets = [0, 0], sizes = [8, 384], strides = [1, 1]} : vector<8x512xf32> to vector<8x384xf32>
    %169 = arith.negf %168 : vector<8x384xf32>
    %170 = math.exp %169 : vector<8x384xf32>
    %cst_70 = arith.constant 1.000000e+00 : f32
    %171 = vector.broadcast %cst_70 : f32 to vector<8x384xf32>
    %172 = arith.addf %171, %170 : vector<8x384xf32>
    %173 = arith.divf %171, %172 : vector<8x384xf32>
    %174 = vector.extract_strided_slice %173 {offsets = [0, 0], sizes = [8, 128], strides = [1, 1]} : vector<8x384xf32> to vector<8x128xf32>
    %175 = vector.extract_strided_slice %173 {offsets = [0, 128], sizes = [8, 128], strides = [1, 1]} : vector<8x384xf32> to vector<8x128xf32>
    %176 = vector.extract_strided_slice %173 {offsets = [0, 256], sizes = [8, 128], strides = [1, 1]} : vector<8x384xf32> to vector<8x128xf32>
    %177 = vector.extract_strided_slice %167 {offsets = [0, 384], sizes = [8, 128], strides = [1, 1]} : vector<8x512xf32> to vector<8x128xf32>
    %178 = math.tanh %177 : vector<8x128xf32>
    %179 = arith.mulf %175, %157 : vector<8x128xf32>
    %180 = arith.mulf %174, %178 : vector<8x128xf32>
    %181 = arith.addf %179, %180 : vector<8x128xf32>
    %182 = math.tanh %181 : vector<8x128xf32>
    %183 = arith.mulf %176, %182 : vector<8x128xf32>
    %c7_i32 = arith.constant 7 : i32
    %c0_71 = arith.constant 0 : index
    %184 = arith.index_cast %c7_i32 : i32 to index
    %c0_72 = arith.constant 0 : index
    %c0_73 = arith.constant 0 : index
    %185 = vector.load %arg7[%c0_71, %184, %c0_72, %c0_73] : memref<1x8x8x512xf32, #tpu.memory_space<vmem>>, vector<1x1x8x512xf32>
    %186 = vector.shape_cast %185 : vector<1x1x8x512xf32> to vector<8x512xf32>
    %187 = arith.truncf %183 : vector<8x128xf32> to vector<8x128xbf16>
    %c0_74 = arith.constant 0 : index
    %c0_75 = arith.constant 0 : index
    %c0_76 = arith.constant 0 : index
    %188 = vector.load %arg4[%c0_74, %c0_75, %c0_76] : memref<1x128x512xbf16, #tpu.memory_space<vmem>>, vector<1x128x512xbf16>
    %189 = vector.shape_cast %188 : vector<1x128x512xbf16> to vector<128x512xbf16>
    %cst_77 = arith.constant dense<0.000000e+00> : vector<8x512xf32>
    %190 = tpu.matmul %187, %189, %cst_77 {dimension_numbers = #tpu.dot_dimension_numbers<[1], [0], [0], [1], [0, 0, 1, 1], [], []>} : vector<8x128xbf16>, vector<128x512xbf16>, vector<8x512xf32> -> vector<8x512xf32>
    %191 = arith.addf %186, %190 : vector<8x512xf32>
    %192 = vector.extract_strided_slice %191 {offsets = [0, 0], sizes = [8, 384], strides = [1, 1]} : vector<8x512xf32> to vector<8x384xf32>
    %193 = arith.negf %192 : vector<8x384xf32>
    %194 = math.exp %193 : vector<8x384xf32>
    %cst_78 = arith.constant 1.000000e+00 : f32
    %195 = vector.broadcast %cst_78 : f32 to vector<8x384xf32>
    %196 = arith.addf %195, %194 : vector<8x384xf32>
    %197 = arith.divf %195, %196 : vector<8x384xf32>
    %198 = vector.extract_strided_slice %197 {offsets = [0, 0], sizes = [8, 128], strides = [1, 1]} : vector<8x384xf32> to vector<8x128xf32>
    %199 = vector.extract_strided_slice %197 {offsets = [0, 128], sizes = [8, 128], strides = [1, 1]} : vector<8x384xf32> to vector<8x128xf32>
    %200 = vector.extract_strided_slice %197 {offsets = [0, 256], sizes = [8, 128], strides = [1, 1]} : vector<8x384xf32> to vector<8x128xf32>
    %201 = vector.extract_strided_slice %191 {offsets = [0, 384], sizes = [8, 128], strides = [1, 1]} : vector<8x512xf32> to vector<8x128xf32>
    %202 = math.tanh %201 : vector<8x128xf32>
    %203 = arith.mulf %199, %181 : vector<8x128xf32>
    %204 = arith.mulf %198, %202 : vector<8x128xf32>
    %205 = arith.addf %203, %204 : vector<8x128xf32>
    %206 = math.tanh %205 : vector<8x128xf32>
    %207 = arith.mulf %200, %206 : vector<8x128xf32>
    %c8_i32 = arith.constant 8 : i32
    %c0_79 = arith.constant 0 : index
    %c0_80 = arith.constant 0 : index
    %c0_81 = arith.constant 0 : index
    %208 = vector.load %arg6[%c0_79, %c0_80, %c0_81] : memref<1x8x128xf32, #tpu.memory_space<vmem>>, vector<1x8x128xf32>
    %209 = vector.shape_cast %208 : vector<1x8x128xf32> to vector<8x128xf32>
    %210 = vector.shape_cast %207 : vector<8x128xf32> to vector<1x8x128xf32>
    tpu.vector_store %arg6[%c0_79, %c0_80, %c0_81], %210 {strides = array<i32>} : memref<1x8x128xf32, #tpu.memory_space<vmem>>, vector<1x8x128xf32>,
    return
  }
  func.func @transform_0(%arg0: i32, %arg1: i32) -> (i32, i32, i32, i32) {
    %c0_i32 = arith.constant 0 : i32
    %c0_i32_0 = arith.constant 0 : i32
    %c0_i32_1 = arith.constant 0 : i32
    return %arg0, %c0_i32, %arg1, %c0_i32_0 : i32, i32, i32, i32
  }
  func.func @transform_1(%arg0: i32, %arg1: i32) -> (i32, i32, i32) {
    %c0_i32 = arith.constant 0 : i32
    %c0_i32_0 = arith.constant 0 : i32
    %c0_i32_1 = arith.constant 0 : i32
    return %arg0, %c0_i32, %c0_i32_0 : i32, i32, i32
  }
  func.func @transform_2(%arg0: i32, %arg1: i32) -> (i32, i32, i32) {
    %c0_i32 = arith.constant 0 : i32
    %c0_i32_0 = arith.constant 0 : i32
    %c0_i32_1 = arith.constant 0 : i32
    return %arg0, %c0_i32, %c0_i32_0 : i32, i32, i32
  }
  func.func @transform_3(%arg0: i32, %arg1: i32) -> (i32, i32, i32) {
    %c0_i32 = arith.constant 0 : i32
    %c0_i32_0 = arith.constant 0 : i32
    %c0_i32_1 = arith.constant 0 : i32
    return %arg0, %c0_i32, %c0_i32_0 : i32, i32, i32
  }
  func.func @transform_4(%arg0: i32, %arg1: i32) -> (i32, i32, i32) {
    %c0_i32 = arith.constant 0 : i32
    %c0_i32_0 = arith.constant 0 : i32
    return %arg0, %arg1, %c0_i32 : i32, i32, i32
  }
}

</mosaic_0001>

<bundles_post_ra>
// kernel: unimodal_context_forward.1
= control target key start
LH: loop header
LB: loop body
LE: loop exit
PB: predicated region body
PF: predicated region fallthrough
CT: control target
= control target key end

     0   :  { %s2386_s15 = smov 0   ;;  %s2388_s16 = smov 0   ;;  %s3052_s0 = inlined_call_operand.vmem [shape: bf16[3,8,8,128], index: 0, kind: input, shape index: {}]   ;;  %s3053_s1 = inlined_call_operand.vmem [shape: bf16[3,128,512], index: 1, kind: input, shape index: {}]   ;;  %s3054_s2 = inlined_call_operand.vmem [shape: bf16[3,128,512], index: 2, kind: input, shape index: {}]   ;;  %s3055_s3 = inlined_call_operand.vmem [shape: f32[3,1,512], index: 3, kind: input, shape index: {}]   ;;  %s3056_s4 = inlined_call_operand.vmem [shape: f32[3,8,128], index: 4, kind: output, shape index: {}]  }
   0x1   :  { %s2390_s17 = smov 0  }
   0x2 LB: > { %s26_s18 = sadd.s32 1, %s2354_s16  ;;  %p1945_p0 = scmp.ge.s32.totalorder %s2358_s17, 1  ;;  %s2358_s17 = sphi %s2390_s17, %s14_s17   ;;  %s2354_s16 = sphi %s2388_s16, %s3103_s16   ;;  %s2350_s15 = sphi %s2386_s15, %s3102_s15  }
   0x3   : > { %p28_p1 = scmp.ge.s32.totalorder %s26_s18, 3  ;;  %p210_p2 = scmp.lt.s32.totalorder %s2358_s17, 4 }
   0x5   : > { %s3105_s18 = smov (%p28_p1, %s26_s18), 0  ;;  %p211_p3 = pnand %p1945_p0, %p210_p2 }
   0x7   : > { %214 = sbr.rel (%p211_p3) target bundleno = 2163 (0x873), region = 36 }
   0xe   : > { %p255_p4 = scmp.lt.s32.totalorder %s2350_s15, 2  ;;  %v3057_v0 = vmov 0  }
   0xf   : > { %563 = vmatprep.mubr.bf16.mxu0 %v3057_v0  ;;  %636 = vmatprep.mubr.bf16.mxu1 %v3057_v0 }
  0x10   : > { %s3107_s15 = smov (!%p255_p4, %s2350_s15), 2 }
  0x11   : > { %s2049_s19 = sshll.u32 %s3107_s15, 8  ;;  %s2048_s23 = sshll.u32 %s3107_s15, 5 }
  0x12   : > { %s2414_s22 = scalar_lea.vmem %s3053_s1, %s2049_s19  ;;  %s2445_s26 = scalar_lea.vmem %s3052_s0, %s2048_s23 }
  0x13   : > { %v2076_v1 = vld [vmem:[%s2414_s22 + $0x4] ss:$16 sps:$4 sm:$0xff]   ;;  %v2078_v2 = vld [vmem:[%s2414_s22 + $0xc] ss:$16 sps:$4 sm:$0xff]   ;;  %v2080_v3 = vld [vmem:[%s2414_s22] ss:$16 sps:$4 sm:$0xff]   ;;  %s2452_s29 = scalar_lea.vmem %s3054_s2, %s2049_s19 }
  0x14   : > { %531 = vmatprep.subr.bf16.mxu0 %v2076_v1  ;;  %v2081_v4 = vld [vmem:[%s2414_s22 + $0x8] ss:$16 sps:$4 sm:$0xff]   ;;  %604 = vmatprep.subr.bf16.mxu1 %v2078_v2  ;;  %v2082_v5 = vld [vmem:[%s2414_s22 + $0x24] ss:$16 sps:$4 sm:$0xff]   ;;  %v2084_v6 = vld [vmem:[%s2414_s22 + $0x2c] ss:$16 sps:$4 sm:$0xff]  }
  0x15   : > { %532 = vmatpush1.bf16.msra.mxu0 %v2080_v3  ;;  %605 = vmatpush1.bf16.msra.mxu1 %v2081_v4  ;;  %v2086_v7 = vld [vmem:[%s2414_s22 + $0x20] ss:$16 sps:$4 sm:$0xff]   ;;  %v2087_v8 = vld [vmem:[%s2414_s22 + $0x28] ss:$16 sps:$4 sm:$0xff]   ;;  %v2088_v9 = vld [vmem:[%s2414_s22 + $0x44] ss:$16 sps:$4 sm:$0xff]  }
  0x16   : > { %533 = vmatprep.subr.bf16.mxu0 %v2082_v5  ;;  %606 = vmatprep.subr.bf16.mxu1 %v2084_v6  ;;  %v2090_v10 = vld [vmem:[%s2414_s22 + $0x4c] ss:$16 sps:$4 sm:$0xff]   ;;  %v2092_v11 = vld [vmem:[%s2414_s22 + $0x40] ss:$16 sps:$4 sm:$0xff]   ;;  %v2093_v12 = vld [vmem:[%s2414_s22 + $0x48] ss:$16 sps:$4 sm:$0xff]   ;;  %v327_v6 = vlaneseq }
  0x17   : > { %v2094_v13 = vld [vmem:[%s2414_s22 + $0x64] ss:$16 sps:$4 sm:$0xff]   ;;  %v2096_v14 = vld [vmem:[%s2414_s22 + $0x6c] ss:$16 sps:$4 sm:$0xff]   ;;  %v2098_v15 = vld [vmem:[%s2414_s22 + $0x60] ss:$16 sps:$4 sm:$0xff]  }
  0x18   : > { %v2099_v16 = vld [vmem:[%s2414_s22 + $0x68] ss:$16 sps:$4 sm:$0xff]   ;;  %v2100_v17 = vld [vmem:[%s2414_s22 + $0x84] ss:$16 sps:$4 sm:$0xff]   ;;  %v2102_v18 = vld [vmem:[%s2414_s22 + $0x8c] ss:$16 sps:$4 sm:$0xff]  }
  0x19   : > { %534 = vmatpush1.bf16.msra.mxu0 %v2086_v7  ;;  %607 = vmatpush1.bf16.msra.mxu1 %v2087_v8  ;;  %v2104_v19 = vld [vmem:[%s2414_s22 + $0x80] ss:$16 sps:$4 sm:$0xff]   ;;  %v2105_v20 = vld [vmem:[%s2414_s22 + $0x88] ss:$16 sps:$4 sm:$0xff]   ;;  %v2106_v21 = vld [vmem:[%s2414_s22 + $0xa4] ss:$16 sps:$4 sm:$0xff]  }
  0x1a   : > { %535 = vmatprep.subr.bf16.mxu0 %v2088_v9  ;;  %608 = vmatprep.subr.bf16.mxu1 %v2090_v10  ;;  %v2108_v22 = vld [vmem:[%s2414_s22 + $0xac] ss:$16 sps:$4 sm:$0xff]   ;;  %v2110_v23 = vld [vmem:[%s2414_s22 + $0xa0] ss:$16 sps:$4 sm:$0xff]   ;;  %v2111_v24 = vld [vmem:[%s2414_s22 + $0xa8] ss:$16 sps:$4 sm:$0xff]  }
  0x1b   : > { %v2112_v25 = vld [vmem:[%s2414_s22 + $0xc4] ss:$16 sps:$4 sm:$0xff]   ;;  %v2114_v26 = vld [vmem:[%s2414_s22 + $0xcc] ss:$16 sps:$4 sm:$0xff]   ;;  %v2116_v27 = vld [vmem:[%s2414_s22 + $0xc0] ss:$16 sps:$4 sm:$0xff]  }
  0x1c   : > { %v2117_v28 = vld [vmem:[%s2414_s22 + $0xc8] ss:$16 sps:$4 sm:$0xff]   ;;  %v2118_v29 = vld [vmem:[%s2414_s22 + $0xe4] ss:$16 sps:$4 sm:$0xff]   ;;  %v2120_v30 = vld [vmem:[%s2414_s22 + $0xec] ss:$16 sps:$4 sm:$0xff]  }
  0x1d   : > { %536 = vmatpush1.bf16.msra.mxu0 %v2092_v11  ;;  %609 = vmatpush1.bf16.msra.mxu1 %v2093_v12  ;;  %v2122_v31 = vld [vmem:[%s2414_s22 + $0xe0] ss:$16 sps:$4 sm:$0xff]   ;;  %v2123_v32 = vld [vmem:[%s2414_s22 + $0xe8] ss:$16 sps:$4 sm:$0xff]   ;;  %v2462_v33 = vld [vmem:[%s2452_s29 + $0x4] ss:$16 sps:$4 sm:$0xff]  }
  0x1e   : > { %537 = vmatprep.subr.bf16.mxu0 %v2094_v13  ;;  %610 = vmatprep.subr.bf16.mxu1 %v2096_v14  ;;  %v2465_v34 = vld [vmem:[%s2452_s29 + $0xc] ss:$16 sps:$4 sm:$0xff]   ;;  %v2124_v35 = vld [vmem:[%s2445_s26] sm:$0xff]   ;;  %v2472_v37 = vld [vmem:[%s2452_s29 + $0x8] ss:$16 sps:$4 sm:$0xff]   ;;  %s1952_s30 = sshll.u32 %s3107_s15, 2 }
  0x1f   : > { %v2469_v36 = vld [vmem:[%s2452_s29] ss:$16 sps:$4 sm:$0xff]   ;;  %v2477_v38 = vld [vmem:[%s2452_s29 + $0x24] ss:$16 sps:$4 sm:$0xff]   ;;  %v2480_v39 = vld [vmem:[%s2452_s29 + $0x2c] ss:$16 sps:$4 sm:$0xff]   ;;  %s276_s7 = scalar_lea.vmem %s3055_s3, %s1952_s30 }
  0x20   : > { %v2483_v40 = vld [vmem:[%s2452_s29 + $0x20] ss:$16 sps:$4 sm:$0xff]   ;;  %v2488_v41 = vld [vmem:[%s2452_s29 + $0x28] ss:$16 sps:$4 sm:$0xff]   ;;  %v2493_v42 = vld [vmem:[%s2452_s29 + $0x44] ss:$16 sps:$4 sm:$0xff]  }
  0x21   : > { %538 = vmatpush1.bf16.msra.mxu0 %v2098_v15  ;;  %611 = vmatpush1.bf16.msra.mxu1 %v2099_v16  ;;  %v2496_v43 = vld [vmem:[%s2452_s29 + $0x4c] ss:$16 sps:$4 sm:$0xff]   ;;  %v2502_v45 = vld [vmem:[%s2452_s29 + $0x40] ss:$16 sps:$4 sm:$0xff]   ;;  %v2505_v46 = vld [vmem:[%s2452_s29 + $0x48] ss:$16 sps:$4 sm:$0xff]  }
  0x22   : > { %539 = vmatprep.subr.bf16.mxu0 %v2100_v17  ;;  %612 = vmatprep.subr.bf16.mxu1 %v2102_v18  ;;  %v2137_v44 = vld [vmem:[%s2445_s26 + $0x8] sm:$0xff]   ;;  %v2510_v47 = vld [vmem:[%s2452_s29 + $0x64] ss:$16 sps:$4 sm:$0xff]   ;;  %v2518_v49 = vld [vmem:[%s2452_s29 + $0x60] ss:$16 sps:$4 sm:$0xff]   ;;  %v328_v7 = vshrl.u32 %v327_v6, 7 }
  0x23   : > { %v2515_v48 = vld [vmem:[%s2452_s29 + $0x6c] ss:$16 sps:$4 sm:$0xff]   ;;  %v2521_v50 = vld [vmem:[%s2452_s29 + $0x68] ss:$16 sps:$4 sm:$0xff]   ;;  %v2526_v51 = vld [vmem:[%s2452_s29 + $0x84] ss:$16 sps:$4 sm:$0xff]  }
  0x24   : > { %v2531_v52 = vld [vmem:[%s2452_s29 + $0x8c] ss:$16 sps:$4 sm:$0xff]   ;;  %v2150_v53 = vld [vmem:[%s2445_s26 + $0x10] sm:$0xff]   ;;  %v2542_v55 = vld [vmem:[%s2452_s29 + $0x88] ss:$16 sps:$4 sm:$0xff]   ;;  %v337_v8 = vsub.s32 2, %v328_v7 }
  0x25   : > { %540 = vmatpush1.bf16.msra.mxu0 %v2104_v19  ;;  %613 = vmatpush1.bf16.msra.mxu1 %v2105_v20  ;;  %v2539_v54 = vld [vmem:[%s2452_s29 + $0x80] ss:$16 sps:$4 sm:$0xff]   ;;  %v2547_v56 = vld [vmem:[%s2452_s29 + $0xa4] ss:$16 sps:$4 sm:$0xff]   ;;  %v2550_v57 = vld [vmem:[%s2452_s29 + $0xac] ss:$16 sps:$4 sm:$0xff]  }
  0x26   : > { %541 = vmatprep.subr.bf16.mxu0 %v2106_v21  ;;  %614 = vmatprep.subr.bf16.mxu1 %v2108_v22  ;;  %v2555_v58 = vld [vmem:[%s2452_s29 + $0xa0] ss:$16 sps:$4 sm:$0xff]   ;;  %v2558_v59 = vld [vmem:[%s2452_s29 + $0xa8] ss:$16 sps:$4 sm:$0xff]   ;;  %v2563_v60 = vld [vmem:[%s2452_s29 + $0xc4] ss:$16 sps:$4 sm:$0xff]  }
  0x27   : > { %v2566_v61 = vld [vmem:[%s2452_s29 + $0xcc] ss:$16 sps:$4 sm:$0xff]   ;;  %v2574_v63 = vld [vmem:[%s2452_s29 + $0xc0] ss:$16 sps:$4 sm:$0xff]   ;;  %v2577_v1 = vld [vmem:[%s2452_s29 + $0xc8] ss:$16 sps:$4 sm:$0xff]  }
  0x28   : > { %v2163_v62 = vld [vmem:[%s2445_s26 + $0x18] sm:$0xff]   ;;  %v2582_v2 = vld [vmem:[%s2452_s29 + $0xe4] ss:$16 sps:$4 sm:$0xff]   ;;  %v2590_v4 = vld [vmem:[%s2452_s29 + $0xe0] ss:$16 sps:$4 sm:$0xff]   ;;  %v341_v9 = vsub.s32 3, %v328_v7 }
  0x29   : > { %542 = vmatpush1.bf16.msra.mxu0 %v2110_v23  ;;  %615 = vmatpush1.bf16.msra.mxu1 %v2111_v24  ;;  %v2585_v3 = vld [vmem:[%s2452_s29 + $0xec] ss:$16 sps:$4 sm:$0xff]   ;;  %v2593_v5 = vld [vmem:[%s2452_s29 + $0xe8] ss:$16 sps:$4 sm:$0xff]   ;;  %v329_v10 = vsub.s32 0, %v328_v7  ;;  %v333_v12 = vsub.s32 1, %v328_v7 }
  0x2a   : > { %543 = vmatprep.subr.bf16.mxu0 %v2112_v25  ;;  %616 = vmatprep.subr.bf16.mxu1 %v2114_v26  ;;  %v325_v11 = vld [vmem:[%s276_s7] sm:$0xf]  ;;  %s1953_s8 = sshll.u32 %s3107_s15, 3 }
  0x2b   : > { %v2643_v13 = vrot.slane %v325_v11, %v337_v8  ;;  %v2649_v16 = vrot.slane %v325_v11, %v341_v9  ;;  %v330_v17 = vrot.slane %v325_v11, %v329_v10  ;;  %v334_v20 = vrot.slane %v325_v11, %v333_v12  ;;  %s283_s11 = scalar_lea.vmem %s3056_s4, %s1953_s8 }
  0x2d   : > { %544 = vmatpush1.bf16.msra.mxu0 %v2116_v27  ;;  %617 = vmatpush1.bf16.msra.mxu1 %v2117_v28 }
  0x2e   : > { %545 = vmatprep.subr.bf16.mxu0 %v2118_v29  ;;  %618 = vmatprep.subr.bf16.mxu1 %v2120_v30 }
  0x31   : > { %546 = vmatpush1.bf16.msra.mxu0 %v2122_v31  ;;  %619 = vmatpush1.bf16.msra.mxu1 %v2123_v32 }
  0x32   : > { %905 = vmatprep.subr.bf16.mxu0 %v2462_v33  ;;  %946 = vmatprep.subr.bf16.mxu1 %v2465_v34 }
  0x34   : > { %564 = vmatmul.mubr.bf16.vlgmr.msra.gmra.mrb[0].mxu0 %v2124_v35  ;;  %637 = vmatmul.mubr.bf16.vlgmr.msra.gmra.mrb[0].mxu1 %v2124_v35 }
  0x35   : > { %906 = vmatpush1.bf16.msra.mxu0 %v2469_v36  ;;  %947 = vmatpush1.bf16.msra.mxu1 %v2472_v37 }
  0x36   : > { %907 = vmatprep.subr.bf16.mxu0 %v2477_v38  ;;  %948 = vmatprep.subr.bf16.mxu1 %v2480_v39 }
  0x37   : > { %573 = vmatprep.mubr.bf16.mxu0 %v3057_v0  ;;  %646 = vmatprep.mubr.bf16.mxu1 %v3057_v0 }
  0x39   : > { %908 = vmatpush1.bf16.msra.mxu0 %v2483_v40  ;;  %949 = vmatpush1.bf16.msra.mxu1 %v2488_v41 }
  0x3a   : > { %909 = vmatprep.subr.bf16.mxu0 %v2493_v42  ;;  %950 = vmatprep.subr.bf16.mxu1 %v2496_v43 }
  0x3c   : > { %574 = vmatmul.mubr.bf16.gmra.mrb[4].mxu0 %v2137_v44  ;;  %647 = vmatmul.mubr.bf16.gmra.mrb[4].mxu1 %v2137_v44 }
  0x3d   : > { %910 = vmatpush1.bf16.msra.mxu0 %v2502_v45  ;;  %951 = vmatpush1.bf16.msra.mxu1 %v2505_v46 }
  0x3e   : > { %911 = vmatprep.subr.bf16.mxu0 %v2510_v47  ;;  %952 = vmatprep.subr.bf16.mxu1 %v2515_v48 }
  0x3f   : > { %583 = vmatprep.mubr.bf16.mxu0 %v3057_v0  ;;  %656 = vmatprep.mubr.bf16.mxu1 %v3057_v0 }
  0x41   : > { %912 = vmatpush1.bf16.msra.mxu0 %v2518_v49  ;;  %953 = vmatpush1.bf16.msra.mxu1 %v2521_v50 }
  0x42   : > { %913 = vmatprep.subr.bf16.mxu0 %v2526_v51  ;;  %954 = vmatprep.subr.bf16.mxu1 %v2531_v52 }
  0x44   : > { %584 = vmatmul.mubr.bf16.gmra.mrb[8].mxu0 %v2150_v53  ;;  %657 = vmatmul.mubr.bf16.gmra.mrb[8].mxu1 %v2150_v53 }
  0x45   : > { %914 = vmatpush1.bf16.msra.mxu0 %v2539_v54  ;;  %955 = vmatpush1.bf16.msra.mxu1 %v2542_v55 }
  0x46   : > { %915 = vmatprep.subr.bf16.mxu0 %v2547_v56  ;;  %956 = vmatprep.subr.bf16.mxu1 %v2550_v57 }
  0x47   : > { %593 = vmatprep.mubr.bf16.mxu0 %v3057_v0  ;;  %666 = vmatprep.mubr.bf16.mxu1 %v3057_v0 }
  0x49   : > { %916 = vmatpush1.bf16.msra.mxu0 %v2555_v58  ;;  %957 = vmatpush1.bf16.msra.mxu1 %v2558_v59 }
  0x4a   : > { %917 = vmatprep.subr.bf16.mxu0 %v2563_v60  ;;  %958 = vmatprep.subr.bf16.mxu1 %v2566_v61 }
  0x4c   : > { %594 = vmatmul.mubr.bf16.gmra.mrb[12].mxu0 %v2163_v62  ;;  %667 = vmatmul.mubr.bf16.gmra.mrb[12].mxu1 %v2163_v62 }
  0x4d   : > { %918 = vmatpush1.bf16.msra.mxu0 %v2574_v63  ;;  %959 = vmatpush1.bf16.msra.mxu1 %v2577_v1 }
  0x4e   : > { %919 = vmatprep.subr.bf16.mxu0 %v2582_v2  ;;  %960 = vmatprep.subr.bf16.mxu1 %v2585_v3 }
  0x4f   : > { %937 = vmatprep.mubr.bf16.mxu0 %v3057_v0  ;;  %978 = vmatprep.mubr.bf16.mxu1 %v3057_v0 }
  0x51   : > { %920 = vmatpush1.bf16.msra.mxu0 %v2590_v4  ;;  %961 = vmatpush1.bf16.msra.mxu1 %v2593_v5 }
  0x52   : > { %1021 = vmatprep.subr.bf16.mxu0 %v2462_v33  ;;  %1062 = vmatprep.subr.bf16.mxu1 %v2465_v34 }
  0x54   : > { %938 = vmatmul.mubr.bf16.vlgmr.msra.gmra.mrb[16].mxu0 %v3057_v0  ;;  %979 = vmatmul.mubr.bf16.vlgmr.msra.gmra.mrb[16].mxu1 %v3057_v0 }
  0x55   : > { %1022 = vmatpush1.bf16.msra.mxu0 %v2469_v36  ;;  %1063 = vmatpush1.bf16.msra.mxu1 %v2472_v37 }
  0x56   : > { %1023 = vmatprep.subr.bf16.mxu0 %v2477_v38  ;;  %1064 = vmatprep.subr.bf16.mxu1 %v2480_v39 }
  0x57   : > { %1053 = vmatprep.mubr.bf16.mxu0 %v3057_v0  ;;  %1094 = vmatprep.mubr.bf16.mxu1 %v3057_v0 }
  0x59   : > { %1024 = vmatpush1.bf16.msra.mxu0 %v2483_v40  ;;  %1065 = vmatpush1.bf16.msra.mxu1 %v2488_v41 }
  0x5a   : > { %1025 = vmatprep.subr.bf16.mxu0 %v2493_v42  ;;  %1066 = vmatprep.subr.bf16.mxu1 %v2496_v43 }
  0x5d   : > { %1026 = vmatpush1.bf16.msra.mxu0 %v2502_v45  ;;  %1067 = vmatpush1.bf16.msra.mxu1 %v2505_v46 }
  0x5e   : > { %1027 = vmatprep.subr.bf16.mxu0 %v2510_v47  ;;  %1068 = vmatprep.subr.bf16.mxu1 %v2515_v48 }
  0x61   : > { %1028 = vmatpush1.bf16.msra.mxu0 %v2518_v49  ;;  %1069 = vmatpush1.bf16.msra.mxu1 %v2521_v50 }
  0x62   : > { %1029 = vmatprep.subr.bf16.mxu0 %v2526_v51  ;;  %1070 = vmatprep.subr.bf16.mxu1 %v2531_v52 }
  0x65   : > { %1030 = vmatpush1.bf16.msra.mxu0 %v2539_v54  ;;  %1071 = vmatpush1.bf16.msra.mxu1 %v2542_v55 }
  0x66   : > { %1031 = vmatprep.subr.bf16.mxu0 %v2547_v56  ;;  %1072 = vmatprep.subr.bf16.mxu1 %v2550_v57 }
  0x69   : > { %1032 = vmatpush1.bf16.msra.mxu0 %v2555_v58  ;;  %1073 = vmatpush1.bf16.msra.mxu1 %v2558_v59 }
  0x6a   : > { %1033 = vmatprep.subr.bf16.mxu0 %v2563_v60  ;;  %1074 = vmatprep.subr.bf16.mxu1 %v2566_v61 }
  0x6d   : > { %1034 = vmatpush1.bf16.msra.mxu0 %v2574_v63  ;;  %1075 = vmatpush1.bf16.msra.mxu1 %v2577_v1 }
  0x6e   : > { %1035 = vmatprep.subr.bf16.mxu0 %v2582_v2  ;;  %1076 = vmatprep.subr.bf16.mxu1 %v2585_v3 }
  0x71   : > { %1036 = vmatpush1.bf16.msra.mxu0 %v2590_v4  ;;  %1077 = vmatpush1.bf16.msra.mxu1 %v2593_v5 }
  0x72   : > { %1137 = vmatprep.subr.bf16.mxu0 %v2462_v33  ;;  %1178 = vmatprep.subr.bf16.mxu1 %v2465_v34 }
 0x107   : > { %v2645_v14 = vpop.f32.mrb[0].mxu0  ;;  %v2647_v15 = vpop.f32.mrb[0].mxu1 }
 0x108   : > { %v567_v18 = vpop.f32.mrb[1].mxu0  ;;  %v640_v19 = vpop.f32.mrb[1].mxu1 }
 0x109   : > { %v569_v21 = vpop.f32.mrb[2].mxu0  ;;  %v642_v22 = vpop.f32.mrb[2].mxu1 }
 0x10a   : > { %v2651_v23 = vadd.f32 %v569_v21, %v330_v17  ;;  %v571_v24 = vpop.f32.mrb[3].mxu0  ;;  %v2654_v25 = vadd.f32 %v642_v22, %v2643_v13  ;;  %v644_v26 = vpop.f32.mrb[3].mxu1 }
 0x10b   : > { %v2656_v27 = vadd.f32 %v571_v24, %v334_v20  ;;  %v2659_v28 = vadd.f32 %v644_v26, %v2649_v16 }
 0x10f   : > { %v575_v29 = vpop.f32.mrb[4].mxu0  ;;  %v648_v30 = vpop.f32.mrb[4].mxu1 }
 0x110   : > { %v2661_v31 = vadd.f32 %v575_v29, %v330_v17  ;;  %v577_v32 = vpop.f32.mrb[5].mxu0  ;;  %v2664_v35 = vadd.f32 %v648_v30, %v2643_v13  ;;  %v650_v44 = vpop.f32.mrb[5].mxu1 }
 0x111   : > { %v2666_v53 = vadd.f32 %v577_v32, %v334_v20  ;;  %v579_v62 = vpop.f32.mrb[6].mxu0  ;;  %v2669_v6 = vadd.f32 %v650_v44, %v2649_v16  ;;  %v652_v7 = vpop.f32.mrb[6].mxu1 }
 0x112   : > { %v2671_v8 = vadd.f32 %v579_v62, %v330_v17  ;;  %v581_v9 = vpop.f32.mrb[7].mxu0  ;;  %v2674_v10 = vadd.f32 %v652_v7, %v2643_v13  ;;  %v654_v11 = vpop.f32.mrb[7].mxu1 }
 0x113   : > { %3059 = vst [vmem:[#allocation3_spill] sm:$0xff] %v2669_v6  ;;  %v2676_v12 = vadd.f32 %v581_v9, %v334_v20  ;;  %v2679_v21 = vadd.f32 %v654_v11, %v2649_v16 }
 0x114   : > { %3060 = vst [vmem:[#allocation4_spill] sm:$0xff] %v2671_v8  ;;  %3061 = vst [vmem:[#allocation5_spill] sm:$0xff] %v2674_v10 }
 0x115   : > { %3062 = vst [vmem:[#allocation6_spill] sm:$0xff] %v2676_v12  ;;  %3063 = vst [vmem:[#allocation7_spill] sm:$0xff] %v2679_v21 }
 0x117   : > { %v585_v22 = vpop.f32.mrb[8].mxu0  ;;  %v658_v24 = vpop.f32.mrb[8].mxu1 }
 0x118   : > { %v2681_v26 = vadd.f32 %v585_v22, %v330_v17  ;;  %v587_v29 = vpop.f32.mrb[9].mxu0  ;;  %v2684_v30 = vadd.f32 %v658_v24, %v2643_v13  ;;  %v660_v32 = vpop.f32.mrb[9].mxu1 }
 0x119   : > { %v2686_v44 = vadd.f32 %v587_v29, %v334_v20  ;;  %v589_v62 = vpop.f32.mrb[10].mxu0  ;;  %v2689_v7 = vadd.f32 %v660_v32, %v2649_v16  ;;  %v662_v9 = vpop.f32.mrb[10].mxu1 }
 0x11a   : > { %3064 = vst [vmem:[#allocation8_spill] sm:$0xff] %v2681_v26  ;;  %3065 = vst [vmem:[#allocation9_spill] sm:$0xff] %v2684_v30  ;;  %v2691_v0 = vadd.f32 %v589_v62, %v330_v17  ;;  %v591_v11 = vpop.f32.mrb[11].mxu0  ;;  %v2694_v21 = vadd.f32 %v662_v9, %v2643_v13  ;;  %v664_v22 = vpop.f32.mrb[11].mxu1 }
 0x11b   : > { %3066 = vst [vmem:[#allocation10_spill] sm:$0xff] %v2686_v44  ;;  %3067 = vst [vmem:[#allocation11_spill] sm:$0xff] %v2689_v7  ;;  %v2696_v26 = vadd.f32 %v591_v11, %v334_v20  ;;  %v2699_v24 = vadd.f32 %v664_v22, %v2649_v16 }
 0x11c   : > { %3068 = vst [vmem:[#allocation12_spill] sm:$0xff] %v2691_v0  ;;  %3069 = vst [vmem:[#allocation13_spill] sm:$0xff] %v2694_v21 }
 0x11d   : > { %3070 = vst [vmem:[#allocation14_spill] sm:$0xff] %v2696_v26  ;;  %3071 = vst [vmem:[#allocation15_spill] sm:$0xff] %v2699_v24 }
 0x11f   : > { %v595_v30 = vpop.f32.mrb[12].mxu0  ;;  %v668_v29 = vpop.f32.mrb[12].mxu1 }
 0x120   : > { %v2701_v44 = vadd.f32 %v595_v30, %v330_v17  ;;  %v597_v12 = vpop.f32.mrb[13].mxu0  ;;  %v2704_v32 = vadd.f32 %v668_v29, %v2643_v13  ;;  %v670_v62 = vpop.f32.mrb[13].mxu1 }
 0x121   : > { %v2706_v0 = vadd.f32 %v597_v12, %v334_v20  ;;  %v599_v7 = vpop.f32.mrb[14].mxu0  ;;  %v2709_v9 = vadd.f32 %v670_v62, %v2649_v16  ;;  %v672_v11 = vpop.f32.mrb[14].mxu1  ;;  %v566_v12 = vadd.f32 %v2645_v14, %v330_v17  ;;  %v568_v62 = vadd.f32 %v567_v18, %v334_v20 }
 0x122   : > { %3072 = vst [vmem:[#allocation16_spill] sm:$0xff] %v2701_v44  ;;  %3073 = vst [vmem:[#allocation17_spill] sm:$0xff] %v2704_v32  ;;  %v2711_v26 = vadd.f32 %v599_v7, %v330_v17  ;;  %v601_v22 = vpop.f32.mrb[15].mxu0  ;;  %v2714_v24 = vadd.f32 %v672_v11, %v2643_v13  ;;  %v674_v30 = vpop.f32.mrb[15].mxu1 }
 0x123   : > { %3074 = vst [vmem:[#allocation18_spill] sm:$0xff] %v2706_v0  ;;  %3075 = vst [vmem:[#allocation19_spill] sm:$0xff] %v2709_v9  ;;  %v2716_v44 = vadd.f32 %v601_v22, %v334_v20  ;;  %v2719_v29 = vadd.f32 %v674_v30, %v2649_v16  ;;  %v639_v0 = vadd.f32 %v2647_v15, %v2643_v13 }
 0x124   : > { %3076 = vst [vmem:[#allocation20_spill] sm:$0xff] %v2711_v26  ;;  %3077 = vst [vmem:[#allocation21_spill] sm:$0xff] %v2714_v24  ;;  %v641_v9 = vadd.f32 %v640_v19, %v2649_v16 }
 0x125   : > { %3078 = vst [vmem:[#allocation22_spill] sm:$0xff] %v2716_v44  ;;  %3079 = vst [vmem:[#allocation23_spill] sm:$0xff] %v2719_v29 }
 0x127   : > { %v939_v7 = vpop.f32.mrb[16].mxu0  ;;  %v980_v26 = vpop.f32.mrb[16].mxu1 }
 0x128   : > { %v987_v32 = vadd.f32 %v939_v7, %v566_v12  ;;  %v989_v21 = vadd.f32 %v980_v26, %v639_v0  ;;  %v941_v11 = vpop.f32.mrb[17].mxu0  ;;  %v982_v24 = vpop.f32.mrb[17].mxu1 }
 0x129   : > { %v988_v10 = vadd.f32 %v941_v11, %v568_v62  ;;  %v990_v22 = vadd.f32 %v982_v24, %v641_v9  ;;  %v943_v44 = vpop.f32.mrb[18].mxu0  ;;  %v984_v8 = vpop.f32.mrb[18].mxu1 }
 0x12a   : > { %v2022_v30 = vmul.f32 -1.442695, %v987_v32  ;;  %v944_v29 = vpop.f32.mrb[19].mxu0  ;;  %v985_v6 = vpop.f32.mrb[19].mxu1  ;;  %v2024_v13 = vmul.f32 -1.442695, %v989_v21 }
 0x12b   : > { %v2023_v14 = vmul.f32 -1.442695, %v988_v10  ;;  %v3080_v29 = vmov 0  }
 0x12c   : > { %2176 = vpow2.f32 %v2022_v30 }
 0x12d   : > { %2178 = vpow2.f32 %v2023_v14 }
 0x12e   : > { %2180 = vtanh.f32 %v990_v22 }
 0x12f   : > { %2182 = vpow2.f32 %v2024_v13 }
 0x136   : > { %v2177_v15 = vpop.eup %2176 }
 0x137   : > { %v1000_v17 = vadd.f32 1.0, %v2177_v15  ;;  %v2179_v16 = vpop.eup %2178 }
 0x138   : > { %v1001_v0 = vadd.f32 1.0, %v2179_v16  ;;  %v2181_v18 = vpop.eup %2180 }
 0x139   : > { %2184 = vrcp.f32 %v1000_v17  ;;  %v2183_v19 = vpop.eup %2182 }
 0x13a   : > { %2186 = vrcp.f32 %v1001_v0  ;;  %v1002_v44 = vadd.f32 1.0, %v2183_v19 }
 0x13c   : > { %2188 = vrcp.f32 %v1002_v44 }
 0x143   : > { %v2185_v20 = vpop.eup %2184 }
 0x144   : > { %v1011_v26 = vmul.f32 %v2185_v20, %v2181_v18  ;;  %v2187_v8 = vpop.eup %2186 }
 0x145   : > { %v1010_v24 = vmul.f32 0.0, %v2187_v8 }
 0x146   : > { %v2189_v10 = vpop.eup %2188 }
 0x147   : > { %v2725_v6 = vadd.f32 %v1011_v26, %v1010_v24 }
 0x149   : > { %2190 = vtanh.f32 %v2725_v6 }
 0x153   : > { %v2191_v21 = vpop.eup %2190 }
 0x154   : > { %v1014_v32 = vmul.f32 %v2191_v21, %v2189_v10 }
 0x156   : > { %v1020_v9 = vpack.c.bf16 %v1014_v32, %v1014_v32 }
 0x158   : > { %1054 = vmatmul.mubr.bf16.vlgmr.msra.gmra.mrb[20].mxu0 %v1020_v9  ;;  %1095 = vmatmul.mubr.bf16.vlgmr.msra.gmra.mrb[20].mxu1 %v1020_v9 }
 0x159   : > { %1138 = vmatpush1.bf16.msra.mxu0 %v2469_v36  ;;  %1179 = vmatpush1.bf16.msra.mxu1 %v2472_v37 }
 0x15a   : > { %1139 = vmatprep.subr.bf16.mxu0 %v2477_v38  ;;  %1180 = vmatprep.subr.bf16.mxu1 %v2480_v39 }
 0x15b   : > { %1169 = vmatprep.mubr.bf16.mxu0 %v3080_v29  ;;  %1210 = vmatprep.mubr.bf16.mxu1 %v3080_v29 }
 0x15d   : > { %1140 = vmatpush1.bf16.msra.mxu0 %v2483_v40  ;;  %1181 = vmatpush1.bf16.msra.mxu1 %v2488_v41 }
 0x15e   : > { %1141 = vmatprep.subr.bf16.mxu0 %v2493_v42  ;;  %1182 = vmatprep.subr.bf16.mxu1 %v2496_v43 }
 0x161   : > { %1142 = vmatpush1.bf16.msra.mxu0 %v2502_v45  ;;  %1183 = vmatpush1.bf16.msra.mxu1 %v2505_v46 }
 0x162   : > { %1143 = vmatprep.subr.bf16.mxu0 %v2510_v47  ;;  %1184 = vmatprep.subr.bf16.mxu1 %v2515_v48 }
 0x165   : > { %1144 = vmatpush1.bf16.msra.mxu0 %v2518_v49  ;;  %1185 = vmatpush1.bf16.msra.mxu1 %v2521_v50 }
 0x166   : > { %1145 = vmatprep.subr.bf16.mxu0 %v2526_v51  ;;  %1186 = vmatprep.subr.bf16.mxu1 %v2531_v52 }
 0x169   : > { %1146 = vmatpush1.bf16.msra.mxu0 %v2539_v54  ;;  %1187 = vmatpush1.bf16.msra.mxu1 %v2542_v55 }
 0x16a   : > { %1147 = vmatprep.subr.bf16.mxu0 %v2547_v56  ;;  %1188 = vmatprep.subr.bf16.mxu1 %v2550_v57 }
 0x16d   : > { %1148 = vmatpush1.bf16.msra.mxu0 %v2555_v58  ;;  %1189 = vmatpush1.bf16.msra.mxu1 %v2558_v59 }
 0x16e   : > { %1149 = vmatprep.subr.bf16.mxu0 %v2563_v60  ;;  %1190 = vmatprep.subr.bf16.mxu1 %v2566_v61 }
 0x171   : > { %1150 = vmatpush1.bf16.msra.mxu0 %v2574_v63  ;;  %1191 = vmatpush1.bf16.msra.mxu1 %v2577_v1 }
 0x172   : > { %1151 = vmatprep.subr.bf16.mxu0 %v2582_v2  ;;  %1192 = vmatprep.subr.bf16.mxu1 %v2585_v3 }
 0x175   : > { %1152 = vmatpush1.bf16.msra.mxu0 %v2590_v4  ;;  %1193 = vmatpush1.bf16.msra.mxu1 %v2593_v5 }
 0x176   : > { %1253 = vmatprep.subr.bf16.mxu0 %v2462_v33  ;;  %1294 = vmatprep.subr.bf16.mxu1 %v2465_v34 }
 0x22b   : > { %v1055_v12 = vpop.f32.mrb[20].mxu0  ;;  %v1096_v62 = vpop.f32.mrb[20].mxu1 }
 0x22c   : > { %v1103_v7 = vadd.f32 %v1055_v12, %v2651_v23  ;;  %v1105_v11 = vadd.f32 %v1096_v62, %v2654_v25  ;;  %v1057_v22 = vpop.f32.mrb[21].mxu0  ;;  %v1098_v30 = vpop.f32.mrb[21].mxu1 }
 0x22d   : > { %v1104_v14 = vadd.f32 %v1057_v22, %v2656_v27  ;;  %v1106_v13 = vadd.f32 %v1098_v30, %v2659_v28  ;;  %v1059_v15 = vpop.f32.mrb[22].mxu0  ;;  %v1100_v17 = vpop.f32.mrb[22].mxu1 }
 0x22e   : > { %v2025_v16 = vmul.f32 -1.442695, %v1103_v7  ;;  %v1060_v0 = vpop.f32.mrb[23].mxu0  ;;  %v1101_v18 = vpop.f32.mrb[23].mxu1  ;;  %v2027_v20 = vmul.f32 -1.442695, %v1105_v11 }
 0x22f   : > { %v2026_v19 = vmul.f32 -1.442695, %v1104_v14 }
 0x230   : > { %2192 = vpow2.f32 %v2025_v16  ;;  %v3081_v16 = vld [vmem:[#allocation3_spill] sm:$0xff] }
 0x231   : > { %2194 = vpow2.f32 %v2026_v19 }
 0x232   : > { %2196 = vtanh.f32 %v1106_v13 }
 0x233   : > { %2198 = vpow2.f32 %v2027_v20 }
 0x23a   : > { %v2193_v26 = vpop.eup %2192 }
 0x23b   : > { %v1116_v8 = vadd.f32 1.0, %v2193_v26  ;;  %v2195_v23 = vpop.eup %2194 }
 0x23c   : > { %v1117_v25 = vadd.f32 1.0, %v2195_v23  ;;  %v2197_v27 = vpop.eup %2196 }
 0x23d   : > { %2200 = vrcp.f32 %v1116_v8  ;;  %v2199_v44 = vpop.eup %2198 }
 0x23e   : > { %2202 = vrcp.f32 %v1117_v25  ;;  %v1118_v21 = vadd.f32 1.0, %v2199_v44 }
 0x240   : > { %2204 = vrcp.f32 %v1118_v21 }
 0x247   : > { %v2201_v28 = vpop.eup %2200 }
 0x248   : > { %v1127_v24 = vmul.f32 %v2201_v28, %v2197_v27  ;;  %v2203_v10 = vpop.eup %2202 }
 0x249   : > { %v1126_v32 = vmul.f32 %v2203_v10, %v2725_v6 }
 0x24a   : > { %v2205_v12 = vpop.eup %2204 }
 0x24b   : > { %v2767_v9 = vadd.f32 %v1127_v24, %v1126_v32 }
 0x24d   : > { %2206 = vtanh.f32 %v2767_v9 }
 0x257   : > { %v2207_v62 = vpop.eup %2206 }
 0x258   : > { %v1130_v7 = vmul.f32 %v2207_v62, %v2205_v12 }
 0x25a   : > { %v1136_v11 = vpack.c.bf16 %v1130_v7, %v1130_v7 }
 0x25c   : > { %1170 = vmatmul.mubr.bf16.vlgmr.msra.gmra.mrb[24].mxu0 %v1136_v11  ;;  %1211 = vmatmul.mubr.bf16.vlgmr.msra.gmra.mrb[24].mxu1 %v1136_v11 }
 0x25d   : > { %1254 = vmatpush1.bf16.msra.mxu0 %v2469_v36  ;;  %1295 = vmatpush1.bf16.msra.mxu1 %v2472_v37 }
 0x25e   : > { %1255 = vmatprep.subr.bf16.mxu0 %v2477_v38  ;;  %1296 = vmatprep.subr.bf16.mxu1 %v2480_v39 }
 0x25f   : > { %1285 = vmatprep.mubr.bf16.mxu0 %v3080_v29  ;;  %1326 = vmatprep.mubr.bf16.mxu1 %v3080_v29 }
 0x261   : > { %1256 = vmatpush1.bf16.msra.mxu0 %v2483_v40  ;;  %1297 = vmatpush1.bf16.msra.mxu1 %v2488_v41 }
 0x262   : > { %1257 = vmatprep.subr.bf16.mxu0 %v2493_v42  ;;  %1298 = vmatprep.subr.bf16.mxu1 %v2496_v43 }
 0x265   : > { %1258 = vmatpush1.bf16.msra.mxu0 %v2502_v45  ;;  %1299 = vmatpush1.bf16.msra.mxu1 %v2505_v46 }
 0x266   : > { %1259 = vmatprep.subr.bf16.mxu0 %v2510_v47  ;;  %1300 = vmatprep.subr.bf16.mxu1 %v2515_v48 }
 0x269   : > { %1260 = vmatpush1.bf16.msra.mxu0 %v2518_v49  ;;  %1301 = vmatpush1.bf16.msra.mxu1 %v2521_v50 }
 0x26a   : > { %1261 = vmatprep.subr.bf16.mxu0 %v2526_v51  ;;  %1302 = vmatprep.subr.bf16.mxu1 %v2531_v52 }
 0x26d   : > { %1262 = vmatpush1.bf16.msra.mxu0 %v2539_v54  ;;  %1303 = vmatpush1.bf16.msra.mxu1 %v2542_v55 }
 0x26e   : > { %1263 = vmatprep.subr.bf16.mxu0 %v2547_v56  ;;  %1304 = vmatprep.subr.bf16.mxu1 %v2550_v57 }
 0x271   : > { %1264 = vmatpush1.bf16.msra.mxu0 %v2555_v58  ;;  %1305 = vmatpush1.bf16.msra.mxu1 %v2558_v59 }
 0x272   : > { %1265 = vmatprep.subr.bf16.mxu0 %v2563_v60  ;;  %1306 = vmatprep.subr.bf16.mxu1 %v2566_v61 }
 0x275   : > { %1266 = vmatpush1.bf16.msra.mxu0 %v2574_v63  ;;  %1307 = vmatpush1.bf16.msra.mxu1 %v2577_v1 }
 0x276   : > { %1267 = vmatprep.subr.bf16.mxu0 %v2582_v2  ;;  %1308 = vmatprep.subr.bf16.mxu1 %v2585_v3 }
 0x279   : > { %1268 = vmatpush1.bf16.msra.mxu0 %v2590_v4  ;;  %1309 = vmatpush1.bf16.msra.mxu1 %v2593_v5 }
 0x27a   : > { %1369 = vmatprep.subr.bf16.mxu0 %v2462_v33  ;;  %1410 = vmatprep.subr.bf16.mxu1 %v2465_v34 }
 0x32f   : > { %v1171_v6 = vpop.f32.mrb[24].mxu0  ;;  %v1212_v22 = vpop.f32.mrb[24].mxu1 }
 0x330   : > { %v1219_v30 = vadd.f32 %v1171_v6, %v2661_v31  ;;  %v1221_v14 = vadd.f32 %v1212_v22, %v2664_v35  ;;  %v1173_v13 = vpop.f32.mrb[25].mxu0  ;;  %v1214_v15 = vpop.f32.mrb[25].mxu1 }
 0x331   : > { %v1220_v17 = vadd.f32 %v1173_v13, %v2666_v53  ;;  %v1222_v0 = vadd.f32 %v1214_v15, %v3081_v16  ;;  %v1175_v18 = vpop.f32.mrb[26].mxu0  ;;  %v1216_v19 = vpop.f32.mrb[26].mxu1  ;;  %v3083_v15 = vld [vmem:[#allocation5_spill] sm:$0xff] }
 0x332   : > { %v2028_v20 = vmul.f32 -1.442695, %v1219_v30  ;;  %v1176_v26 = vpop.f32.mrb[27].mxu0  ;;  %v1217_v8 = vpop.f32.mrb[27].mxu1  ;;  %v2030_v25 = vmul.f32 -1.442695, %v1221_v14 }
 0x333   : > { %v2029_v23 = vmul.f32 -1.442695, %v1220_v17  ;;  %v3082_v14 = vld [vmem:[#allocation4_spill] sm:$0xff]  ;;  %v3084_v18 = vld [vmem:[#allocation6_spill] sm:$0xff] }
 0x334   : > { %2208 = vpow2.f32 %v2028_v20  ;;  %v3085_v20 = vld [vmem:[#allocation7_spill] sm:$0xff] }
 0x335   : > { %2210 = vpow2.f32 %v2029_v23 }
 0x336   : > { %2212 = vtanh.f32 %v1222_v0 }
 0x337   : > { %2214 = vpow2.f32 %v2030_v25 }
 0x33e   : > { %v2209_v27 = vpop.eup %2208 }
 0x33f   : > { %v1232_v44 = vadd.f32 1.0, %v2209_v27  ;;  %v2211_v31 = vpop.eup %2210 }
 0x340   : > { %v1233_v35 = vadd.f32 1.0, %v2211_v31  ;;  %v2213_v53 = vpop.eup %2212 }
 0x341   : > { %2216 = vrcp.f32 %v1232_v44  ;;  %v2215_v28 = vpop.eup %2214 }
 0x342   : > { %2218 = vrcp.f32 %v1233_v35  ;;  %v1234_v32 = vadd.f32 1.0, %v2215_v28 }
 0x344   : > { %2220 = vrcp.f32 %v1234_v32 }
 0x34b   : > { %v2217_v24 = vpop.eup %2216 }
 0x34c   : > { %v1243_v10 = vmul.f32 %v2217_v24, %v2213_v53  ;;  %v2219_v21 = vpop.eup %2218 }
 0x34d   : > { %v1242_v12 = vmul.f32 %v2219_v21, %v2767_v9 }
 0x34e   : > { %v2221_v7 = vpop.eup %2220 }
 0x34f   : > { %v2809_v62 = vadd.f32 %v1243_v10, %v1242_v12 }
 0x351   : > { %2222 = vtanh.f32 %v2809_v62 }
 0x35b   : > { %v2223_v11 = vpop.eup %2222 }
 0x35c   : > { %v1246_v6 = vmul.f32 %v2223_v11, %v2221_v7 }
 0x35e   : > { %v1252_v22 = vpack.c.bf16 %v1246_v6, %v1246_v6 }
 0x360   : > { %1286 = vmatmul.mubr.bf16.vlgmr.msra.gmra.mrb[28].mxu0 %v1252_v22  ;;  %1327 = vmatmul.mubr.bf16.vlgmr.msra.gmra.mrb[28].mxu1 %v1252_v22 }
 0x361   : > { %1370 = vmatpush1.bf16.msra.mxu0 %v2469_v36  ;;  %1411 = vmatpush1.bf16.msra.mxu1 %v2472_v37 }
 0x362   : > { %1371 = vmatprep.subr.bf16.mxu0 %v2477_v38  ;;  %1412 = vmatprep.subr.bf16.mxu1 %v2480_v39 }
 0x363   : > { %1401 = vmatprep.mubr.bf16.mxu0 %v3080_v29  ;;  %1442 = vmatprep.mubr.bf16.mxu1 %v3080_v29 }
 0x365   : > { %1372 = vmatpush1.bf16.msra.mxu0 %v2483_v40  ;;  %1413 = vmatpush1.bf16.msra.mxu1 %v2488_v41 }
 0x366   : > { %1373 = vmatprep.subr.bf16.mxu0 %v2493_v42  ;;  %1414 = vmatprep.subr.bf16.mxu1 %v2496_v43 }
 0x369   : > { %1374 = vmatpush1.bf16.msra.mxu0 %v2502_v45  ;;  %1415 = vmatpush1.bf16.msra.mxu1 %v2505_v46 }
 0x36a   : > { %1375 = vmatprep.subr.bf16.mxu0 %v2510_v47  ;;  %1416 = vmatprep.subr.bf16.mxu1 %v2515_v48 }
 0x36d   : > { %1376 = vmatpush1.bf16.msra.mxu0 %v2518_v49  ;;  %1417 = vmatpush1.bf16.msra.mxu1 %v2521_v50 }
 0x36e   : > { %1377 = vmatprep.subr.bf16.mxu0 %v2526_v51  ;;  %1418 = vmatprep.subr.bf16.mxu1 %v2531_v52 }
 0x371   : > { %1378 = vmatpush1.bf16.msra.mxu0 %v2539_v54  ;;  %1419 = vmatpush1.bf16.msra.mxu1 %v2542_v55 }
 0x372   : > { %1379 = vmatprep.subr.bf16.mxu0 %v2547_v56  ;;  %1420 = vmatprep.subr.bf16.mxu1 %v2550_v57 }
 0x375   : > { %1380 = vmatpush1.bf16.msra.mxu0 %v2555_v58  ;;  %1421 = vmatpush1.bf16.msra.mxu1 %v2558_v59 }
 0x376   : > { %1381 = vmatprep.subr.bf16.mxu0 %v2563_v60  ;;  %1422 = vmatprep.subr.bf16.mxu1 %v2566_v61 }
 0x379   : > { %1382 = vmatpush1.bf16.msra.mxu0 %v2574_v63  ;;  %1423 = vmatpush1.bf16.msra.mxu1 %v2577_v1 }
 0x37a   : > { %1383 = vmatprep.subr.bf16.mxu0 %v2582_v2  ;;  %1424 = vmatprep.subr.bf16.mxu1 %v2585_v3 }
 0x37d   : > { %1384 = vmatpush1.bf16.msra.mxu0 %v2590_v4  ;;  %1425 = vmatpush1.bf16.msra.mxu1 %v2593_v5 }
 0x37e   : > { %1485 = vmatprep.subr.bf16.mxu0 %v2462_v33  ;;  %1526 = vmatprep.subr.bf16.mxu1 %v2465_v34 }
 0x433   : > { %v1287_v9 = vpop.f32.mrb[28].mxu0  ;;  %v1328_v30 = vpop.f32.mrb[28].mxu1 }
 0x434   : > { %v1335_v13 = vadd.f32 %v1287_v9, %v3082_v14  ;;  %v1337_v17 = vadd.f32 %v1328_v30, %v3083_v15  ;;  %v1289_v16 = vpop.f32.mrb[29].mxu0  ;;  %v1330_v0 = vpop.f32.mrb[29].mxu1 }
 0x435   : > { %v1336_v19 = vadd.f32 %v1289_v16, %v3084_v18  ;;  %v1338_v26 = vadd.f32 %v1330_v0, %v3085_v20  ;;  %v1291_v8 = vpop.f32.mrb[30].mxu0  ;;  %v1332_v23 = vpop.f32.mrb[30].mxu1 }
 0x436   : > { %v2031_v25 = vmul.f32 -1.442695, %v1335_v13  ;;  %v1292_v27 = vpop.f32.mrb[31].mxu0  ;;  %v1333_v44 = vpop.f32.mrb[31].mxu1  ;;  %v2033_v34 = vmul.f32 -1.442695, %v1337_v17 }
 0x437   : > { %v2032_v33 = vmul.f32 -1.442695, %v1336_v19 }
 0x438   : > { %2224 = vpow2.f32 %v2031_v25 }
 0x439   : > { %2226 = vpow2.f32 %v2032_v33 }
 0x43a   : > { %2228 = vtanh.f32 %v1338_v26 }
 0x43b   : > { %2230 = vpow2.f32 %v2033_v34 }
 0x442   : > { %v2225_v31 = vpop.eup %2224 }
 0x443   : > { %v1348_v35 = vadd.f32 1.0, %v2225_v31  ;;  %v2227_v53 = vpop.eup %2226 }
 0x444   : > { %v1349_v28 = vadd.f32 1.0, %v2227_v53  ;;  %v2229_v24 = vpop.eup %2228  ;;  %v2903_v53 = vld [vmem:[%s2452_s29] ss:$16 sps:$4 sm:$0xff]  }
 0x445   : > { %2232 = vrcp.f32 %v1348_v35  ;;  %v2231_v10 = vpop.eup %2230 }
 0x446   : > { %2234 = vrcp.f32 %v1349_v28  ;;  %v1350_v7 = vadd.f32 1.0, %v2231_v10  ;;  %v2907_v28 = vld [vmem:[%s2452_s29 + $0x8] ss:$16 sps:$4 sm:$0xff]   ;;  %v2915_v10 = vld [vmem:[%s2452_s29 + $0x2c] ss:$16 sps:$4 sm:$0xff]  }
 0x448   : > { %2236 = vrcp.f32 %v1350_v7  ;;  %v2933_v7 = vld [vmem:[%s2452_s29 + $0x4c] ss:$16 sps:$4 sm:$0xff]  }
 0x44f   : > { %v2233_v21 = vpop.eup %2232 }
 0x450   : > { %v1359_v32 = vmul.f32 %v2233_v21, %v2229_v24  ;;  %v2235_v12 = vpop.eup %2234  ;;  %v2911_v24 = vld [vmem:[%s2452_s29 + $0x24] ss:$16 sps:$4 sm:$0xff]   ;;  %v2921_v21 = vld [vmem:[%s2452_s29 + $0x20] ss:$16 sps:$4 sm:$0xff]  }
 0x451   : > { %v1358_v11 = vmul.f32 %v2235_v12, %v2809_v62  ;;  %v2929_v12 = vld [vmem:[%s2452_s29 + $0x44] ss:$16 sps:$4 sm:$0xff]  }
 0x452   : > { %v2237_v22 = vpop.eup %2236 }
 0x453   : > { %v2851_v6 = vadd.f32 %v1359_v32, %v1358_v11  ;;  %v2925_v32 = vld [vmem:[%s2452_s29 + $0x28] ss:$16 sps:$4 sm:$0xff]   ;;  %v2937_v11 = vld [vmem:[%s2452_s29 + $0x40] ss:$16 sps:$4 sm:$0xff]  }
 0x455   : > { %2238 = vtanh.f32 %v2851_v6 }
 0x45f   : > { %v2239_v9 = vpop.eup %2238 }
 0x460   : > { %v1362_v30 = vmul.f32 %v2239_v9, %v2237_v22  ;;  %v2945_v22 = vld [vmem:[%s2452_s29 + $0x64] ss:$16 sps:$4 sm:$0xff]   ;;  %v2949_v9 = vld [vmem:[%s2452_s29 + $0x6c] ss:$16 sps:$4 sm:$0xff]  }
 0x462   : > { %v1368_v14 = vpack.c.bf16 %v1362_v30, %v1362_v30  ;;  %v2953_v30 = vld [vmem:[%s2452_s29 + $0x60] ss:$16 sps:$4 sm:$0xff]  }
 0x464   : > { %1402 = vmatmul.mubr.bf16.vlgmr.msra.gmra.mrb[32].mxu0 %v1368_v14  ;;  %1443 = vmatmul.mubr.bf16.vlgmr.msra.gmra.mrb[32].mxu1 %v1368_v14  ;;  %v2957_v14 = vld [vmem:[%s2452_s29 + $0x68] ss:$16 sps:$4 sm:$0xff]  }
 0x465   : > { %1486 = vmatpush1.bf16.msra.mxu0 %v2469_v36  ;;  %1527 = vmatpush1.bf16.msra.mxu1 %v2472_v37  ;;  %v2887_v36 = vld [vmem:[%s2452_s29 + $0x4] ss:$16 sps:$4 sm:$0xff]   ;;  %v2891_v37 = vld [vmem:[%s2452_s29 + $0xc] ss:$16 sps:$4 sm:$0xff]  }
 0x466   : > { %1487 = vmatprep.subr.bf16.mxu0 %v2477_v38  ;;  %1528 = vmatprep.subr.bf16.mxu1 %v2480_v39 }
 0x467   : > { %1517 = vmatprep.mubr.bf16.mxu0 %v3080_v29  ;;  %1558 = vmatprep.mubr.bf16.mxu1 %v3080_v29 }
 0x469   : > { %1488 = vmatpush1.bf16.msra.mxu0 %v2483_v40  ;;  %1529 = vmatpush1.bf16.msra.mxu1 %v2488_v41  ;;  %v3086_v40 = vld [vmem:[#allocation8_spill] sm:$0xff] }
 0x46a   : > { %1489 = vmatprep.subr.bf16.mxu0 %v2493_v42  ;;  %1530 = vmatprep.subr.bf16.mxu1 %v2496_v43  ;;  %v3087_v42 = vld [vmem:[#allocation9_spill] sm:$0xff] }
 0x46d   : > { %1490 = vmatpush1.bf16.msra.mxu0 %v2502_v45  ;;  %1531 = vmatpush1.bf16.msra.mxu1 %v2505_v46 }
 0x46e   : > { %1491 = vmatprep.subr.bf16.mxu0 %v2510_v47  ;;  %1532 = vmatprep.subr.bf16.mxu1 %v2515_v48  ;;  %v3088_v47 = vld [vmem:[#allocation10_spill] sm:$0xff] }
 0x471   : > { %1492 = vmatpush1.bf16.msra.mxu0 %v2518_v49  ;;  %1533 = vmatpush1.bf16.msra.mxu1 %v2521_v50  ;;  %v3089_v49 = vld [vmem:[#allocation11_spill] sm:$0xff] }
 0x472   : > { %1493 = vmatprep.subr.bf16.mxu0 %v2526_v51  ;;  %1534 = vmatprep.subr.bf16.mxu1 %v2531_v52 }
 0x475   : > { %1494 = vmatpush1.bf16.msra.mxu0 %v2539_v54  ;;  %1535 = vmatpush1.bf16.msra.mxu1 %v2542_v55 }
 0x476   : > { %1495 = vmatprep.subr.bf16.mxu0 %v2547_v56  ;;  %1536 = vmatprep.subr.bf16.mxu1 %v2550_v57 }
 0x479   : > { %1496 = vmatpush1.bf16.msra.mxu0 %v2555_v58  ;;  %1537 = vmatpush1.bf16.msra.mxu1 %v2558_v59 }
 0x47a   : > { %1497 = vmatprep.subr.bf16.mxu0 %v2563_v60  ;;  %1538 = vmatprep.subr.bf16.mxu1 %v2566_v61 }
 0x47d   : > { %1498 = vmatpush1.bf16.msra.mxu0 %v2574_v63  ;;  %1539 = vmatpush1.bf16.msra.mxu1 %v2577_v1 }
 0x47e   : > { %1499 = vmatprep.subr.bf16.mxu0 %v2582_v2  ;;  %1540 = vmatprep.subr.bf16.mxu1 %v2585_v3 }
 0x481   : > { %1500 = vmatpush1.bf16.msra.mxu0 %v2590_v4  ;;  %1541 = vmatpush1.bf16.msra.mxu1 %v2593_v5 }
 0x482   : > { %1601 = vmatprep.subr.bf16.mxu0 %v2887_v36  ;;  %1642 = vmatprep.subr.bf16.mxu1 %v2891_v37 }
 0x537   : > { %v1403_v38 = vpop.f32.mrb[32].mxu0  ;;  %v1444_v39 = vpop.f32.mrb[32].mxu1 }
 0x538   : > { %v1451_v41 = vadd.f32 %v1403_v38, %v3086_v40  ;;  %v1453_v43 = vadd.f32 %v1444_v39, %v3087_v42  ;;  %v1405_v45 = vpop.f32.mrb[33].mxu0  ;;  %v1446_v46 = vpop.f32.mrb[33].mxu1  ;;  %v2961_v38 = vld [vmem:[%s2452_s29 + $0x84] ss:$16 sps:$4 sm:$0xff]   ;;  %v2965_v39 = vld [vmem:[%s2452_s29 + $0x8c] ss:$16 sps:$4 sm:$0xff]  }
 0x539   : > { %v1452_v48 = vadd.f32 %v1405_v45, %v3088_v47  ;;  %v1454_v50 = vadd.f32 %v1446_v46, %v3089_v49  ;;  %v1407_v51 = vpop.f32.mrb[34].mxu0  ;;  %v1448_v52 = vpop.f32.mrb[34].mxu1  ;;  %v2969_v40 = vld [vmem:[%s2452_s29 + $0x80] ss:$16 sps:$4 sm:$0xff]   ;;  %v3092_v42 = vld [vmem:[#allocation14_spill] sm:$0xff] }
 0x53a   : > { %v2034_v54 = vmul.f32 -1.442695, %v1451_v41  ;;  %v1408_v55 = vpop.f32.mrb[35].mxu0  ;;  %v1449_v62 = vpop.f32.mrb[35].mxu1  ;;  %v2036_v15 = vmul.f32 -1.442695, %v1453_v43 }
 0x53b   : > { %v2035_v13 = vmul.f32 -1.442695, %v1452_v48  ;;  %v2973_v41 = vld [vmem:[%s2452_s29 + $0x88] ss:$16 sps:$4 sm:$0xff]   ;;  %v3093_v43 = vld [vmem:[#allocation15_spill] sm:$0xff] }
 0x53c   : > { %2240 = vpow2.f32 %v2034_v54 }
 0x53d   : > { %2242 = vpow2.f32 %v2035_v13 }
 0x53e   : > { %2244 = vtanh.f32 %v1454_v50 }
 0x53f   : > { %2246 = vpow2.f32 %v2036_v15 }
 0x546   : > { %v2241_v17 = vpop.eup %2240 }
 0x547   : > { %v1464_v16 = vadd.f32 1.0, %v2241_v17  ;;  %v2243_v0 = vpop.eup %2242 }
 0x548   : > { %v1465_v18 = vadd.f32 1.0, %v2243_v0  ;;  %v2245_v19 = vpop.eup %2244 }
 0x549   : > { %2248 = vrcp.f32 %v1464_v16  ;;  %v2247_v20 = vpop.eup %2246 }
 0x54a   : > { %2250 = vrcp.f32 %v1465_v18  ;;  %v1466_v25 = vadd.f32 1.0, %v2247_v20 }
 0x54c   : > { %2252 = vrcp.f32 %v1466_v25  ;;  %v2328_v25 = vld [vmem:[%s2452_s29 + $0xc4] ss:$16 sps:$4 sm:$0xff]  }
 0x553   : > { %v2249_v26 = vpop.eup %2248 }
 0x554   : > { %v1475_v8 = vmul.f32 %v2249_v26, %v2245_v19  ;;  %v2251_v23 = vpop.eup %2250  ;;  %v2325_v26 = vld [vmem:[%s2452_s29 + $0xac] ss:$16 sps:$4 sm:$0xff]  }
 0x555   : > { %v1474_v27 = vmul.f32 %v2251_v23, %v2851_v6  ;;  %v2941_v6 = vld [vmem:[%s2452_s29 + $0x48] ss:$16 sps:$4 sm:$0xff]  }
 0x556   : > { %v2253_v33 = vpop.eup %2252  ;;  %v2327_v23 = vld [vmem:[%s2452_s29 + $0xa8] ss:$16 sps:$4 sm:$0xff]  }
 0x557   : > { %v2899_v44 = vadd.f32 %v1475_v8, %v1474_v27  ;;  %v2326_v8 = vld [vmem:[%s2452_s29 + $0xa0] ss:$16 sps:$4 sm:$0xff]   ;;  %v2329_v27 = vld [vmem:[%s2452_s29 + $0xcc] ss:$16 sps:$4 sm:$0xff]  }
 0x559   : > { %2254 = vtanh.f32 %v2899_v44 }
 0x563   : > { %v2255_v34 = vpop.eup %2254 }
 0x564   : > { %v1478_v31 = vmul.f32 %v2255_v34, %v2253_v33  ;;  %v2331_v33 = vld [vmem:[%s2452_s29 + $0xc8] ss:$16 sps:$4 sm:$0xff]   ;;  %v2332_v34 = vld [vmem:[%s2452_s29 + $0xe4] ss:$16 sps:$4 sm:$0xff]  }
 0x566   : > { %v1484_v35 = vpack.c.bf16 %v1478_v31, %v1478_v31  ;;  %v2333_v31 = vld [vmem:[%s2452_s29 + $0xec] ss:$16 sps:$4 sm:$0xff]  }
 0x568   : > { %1518 = vmatmul.mubr.bf16.vlgmr.msra.gmra.mrb[36].mxu0 %v1484_v35  ;;  %1559 = vmatmul.mubr.bf16.vlgmr.msra.gmra.mrb[36].mxu1 %v1484_v35  ;;  %v2334_v35 = vld [vmem:[%s2452_s29 + $0xe0] ss:$16 sps:$4 sm:$0xff]  }
 0x569   : > { %1602 = vmatpush1.bf16.msra.mxu0 %v2903_v53  ;;  %1643 = vmatpush1.bf16.msra.mxu1 %v2907_v28 }
 0x56a   : > { %1603 = vmatprep.subr.bf16.mxu0 %v2911_v24  ;;  %1644 = vmatprep.subr.bf16.mxu1 %v2915_v10 }
 0x56b   : > { %1633 = vmatprep.mubr.bf16.mxu0 %v3080_v29  ;;  %1674 = vmatprep.mubr.bf16.mxu1 %v3080_v29 }
 0x56d   : > { %1604 = vmatpush1.bf16.msra.mxu0 %v2921_v21  ;;  %1645 = vmatpush1.bf16.msra.mxu1 %v2925_v32 }
 0x56e   : > { %1605 = vmatprep.subr.bf16.mxu0 %v2929_v12  ;;  %1646 = vmatprep.subr.bf16.mxu1 %v2933_v7 }
 0x571   : > { %1606 = vmatpush1.bf16.msra.mxu0 %v2937_v11  ;;  %1647 = vmatpush1.bf16.msra.mxu1 %v2941_v6 }
 0x572   : > { %1607 = vmatprep.subr.bf16.mxu0 %v2945_v22  ;;  %1648 = vmatprep.subr.bf16.mxu1 %v2949_v9 }
 0x575   : > { %1608 = vmatpush1.bf16.msra.mxu0 %v2953_v30  ;;  %1649 = vmatpush1.bf16.msra.mxu1 %v2957_v14 }
 0x576   : > { %1609 = vmatprep.subr.bf16.mxu0 %v2961_v38  ;;  %1650 = vmatprep.subr.bf16.mxu1 %v2965_v39 }
 0x579   : > { %1610 = vmatpush1.bf16.msra.mxu0 %v2969_v40  ;;  %1651 = vmatpush1.bf16.msra.mxu1 %v2973_v41 }
 0x57a   : > { %1611 = vmatprep.subr.bf16.mxu0 %v2547_v56  ;;  %1652 = vmatprep.subr.bf16.mxu1 %v2550_v57 }
 0x57d   : > { %1612 = vmatpush1.bf16.msra.mxu0 %v2555_v58  ;;  %1653 = vmatpush1.bf16.msra.mxu1 %v2558_v59  ;;  %v3090_v58 = vld [vmem:[#allocation12_spill] sm:$0xff] }
 0x57e   : > { %1613 = vmatprep.subr.bf16.mxu0 %v2563_v60  ;;  %1654 = vmatprep.subr.bf16.mxu1 %v2566_v61  ;;  %v3091_v60 = vld [vmem:[#allocation13_spill] sm:$0xff] }
 0x581   : > { %1614 = vmatpush1.bf16.msra.mxu0 %v2574_v63  ;;  %1655 = vmatpush1.bf16.msra.mxu1 %v2577_v1 }
 0x582   : > { %1615 = vmatprep.subr.bf16.mxu0 %v2582_v2  ;;  %1656 = vmatprep.subr.bf16.mxu1 %v2585_v3 }
 0x585   : > { %1616 = vmatpush1.bf16.msra.mxu0 %v2590_v4  ;;  %1657 = vmatpush1.bf16.msra.mxu1 %v2593_v5 }
 0x586   : > { %1717 = vmatprep.subr.bf16.mxu0 %v2887_v36  ;;  %1758 = vmatprep.subr.bf16.mxu1 %v2891_v37 }
 0x63b   : > { %v1519_v56 = vpop.f32.mrb[36].mxu0  ;;  %v1560_v57 = vpop.f32.mrb[36].mxu1 }
 0x63c   : > { %v1567_v59 = vadd.f32 %v1519_v56, %v3090_v58  ;;  %v1569_v61 = vadd.f32 %v1560_v57, %v3091_v60  ;;  %v1521_v63 = vpop.f32.mrb[37].mxu0  ;;  %v1562_v1 = vpop.f32.mrb[37].mxu1 }
 0x63d   : > { %v1568_v2 = vadd.f32 %v1521_v63, %v3092_v42  ;;  %v1570_v3 = vadd.f32 %v1562_v1, %v3093_v43  ;;  %v1523_v45 = vpop.f32.mrb[38].mxu0  ;;  %v1564_v4 = vpop.f32.mrb[38].mxu1 }
 0x63e   : > { %v2037_v46 = vmul.f32 -1.442695, %v1567_v59  ;;  %v1524_v5 = vpop.f32.mrb[39].mxu0  ;;  %v1565_v47 = vpop.f32.mrb[39].mxu1  ;;  %v2039_v37 = vmul.f32 -1.442695, %v1569_v61 }
 0x63f   : > { %v2038_v36 = vmul.f32 -1.442695, %v1568_v2 }
 0x640   : > { %2256 = vpow2.f32 %v2037_v46 }
 0x641   : > { %2258 = vpow2.f32 %v2038_v36 }
 0x642   : > { %2260 = vtanh.f32 %v1570_v3 }
 0x643   : > { %2262 = vpow2.f32 %v2039_v37 }
 0x64a   : > { %v2257_v48 = vpop.eup %2256 }
 0x64b   : > { %v1580_v49 = vadd.f32 1.0, %v2257_v48  ;;  %v2259_v50 = vpop.eup %2258 }
 0x64c   : > { %v1581_v51 = vadd.f32 1.0, %v2259_v50  ;;  %v2261_v52 = vpop.eup %2260 }
 0x64d   : > { %2264 = vrcp.f32 %v1580_v49  ;;  %v2263_v54 = vpop.eup %2262  ;;  %v3098_v49 = vld [vmem:[#allocation20_spill] sm:$0xff] }
 0x64e   : > { %2266 = vrcp.f32 %v1581_v51  ;;  %v1582_v15 = vadd.f32 1.0, %v2263_v54  ;;  %v3099_v51 = vld [vmem:[#allocation21_spill] sm:$0xff] }
 0x650   : > { %2268 = vrcp.f32 %v1582_v15  ;;  %v3101_v15 = vld [vmem:[#allocation23_spill] sm:$0xff] }
 0x657   : > { %v2265_v55 = vpop.eup %2264 }
 0x658   : > { %v1591_v62 = vmul.f32 %v2265_v55, %v2261_v52  ;;  %v2267_v13 = vpop.eup %2266 }
 0x659   : > { %v1590_v17 = vmul.f32 %v2267_v13, %v2899_v44  ;;  %v2330_v44 = vld [vmem:[%s2452_s29 + $0xc0] ss:$16 sps:$4 sm:$0xff]  }
 0x65a   : > { %v2269_v0 = vpop.eup %2268 }
 0x65b   : > { %v2995_v16 = vadd.f32 %v1591_v62, %v1590_v17  ;;  %v3100_v62 = vld [vmem:[#allocation22_spill] sm:$0xff] }
 0x65d   : > { %2270 = vtanh.f32 %v2995_v16 }
 0x667   : > { %v2271_v18 = vpop.eup %2270 }
 0x668   : > { %v1594_v19 = vmul.f32 %v2271_v18, %v2269_v0 }
 0x66a   : > { %v1600_v20 = vpack.c.bf16 %v1594_v19, %v1594_v19 }
 0x66c   : > { %1634 = vmatmul.mubr.bf16.vlgmr.msra.gmra.mrb[40].mxu0 %v1600_v20  ;;  %1675 = vmatmul.mubr.bf16.vlgmr.msra.gmra.mrb[40].mxu1 %v1600_v20 }
 0x66d   : > { %1718 = vmatpush1.bf16.msra.mxu0 %v2903_v53  ;;  %1759 = vmatpush1.bf16.msra.mxu1 %v2907_v28  ;;  %v2335_v53 = vld [vmem:[%s2452_s29 + $0xe8] ss:$16 sps:$4 sm:$0xff]  }
 0x66e   : > { %1719 = vmatprep.subr.bf16.mxu0 %v2911_v24  ;;  %1760 = vmatprep.subr.bf16.mxu1 %v2915_v10  ;;  %v3094_v10 = vld [vmem:[#allocation16_spill] sm:$0xff] }
 0x66f   : > { %1749 = vmatprep.mubr.bf16.mxu0 %v3080_v29  ;;  %1790 = vmatprep.mubr.bf16.mxu1 %v3080_v29  ;;  %v2324_v29 = vld [vmem:[%s2452_s29 + $0xa4] ss:$16 sps:$4 sm:$0xff]  }
 0x671   : > { %1720 = vmatpush1.bf16.msra.mxu0 %v2921_v21  ;;  %1761 = vmatpush1.bf16.msra.mxu1 %v2925_v32  ;;  %v3095_v32 = vld [vmem:[#allocation17_spill] sm:$0xff] }
 0x672   : > { %1721 = vmatprep.subr.bf16.mxu0 %v2929_v12  ;;  %1762 = vmatprep.subr.bf16.mxu1 %v2933_v7 }
 0x675   : > { %1722 = vmatpush1.bf16.msra.mxu0 %v2937_v11  ;;  %1763 = vmatpush1.bf16.msra.mxu1 %v2941_v6  ;;  %v3096_v6 = vld [vmem:[#allocation18_spill] sm:$0xff] }
 0x676   : > { %1723 = vmatprep.subr.bf16.mxu0 %v2945_v22  ;;  %1764 = vmatprep.subr.bf16.mxu1 %v2949_v9  ;;  %v3097_v9 = vld [vmem:[#allocation19_spill] sm:$0xff] }
 0x679   : > { %1724 = vmatpush1.bf16.msra.mxu0 %v2953_v30  ;;  %1765 = vmatpush1.bf16.msra.mxu1 %v2957_v14 }
 0x67a   : > { %1725 = vmatprep.subr.bf16.mxu0 %v2961_v38  ;;  %1766 = vmatprep.subr.bf16.mxu1 %v2965_v39 }
 0x67d   : > { %1726 = vmatpush1.bf16.msra.mxu0 %v2969_v40  ;;  %1767 = vmatpush1.bf16.msra.mxu1 %v2973_v41 }
 0x67e   : > { %1727 = vmatprep.subr.bf16.mxu0 %v2324_v29  ;;  %1768 = vmatprep.subr.bf16.mxu1 %v2325_v26 }
 0x681   : > { %1728 = vmatpush1.bf16.msra.mxu0 %v2326_v8  ;;  %1769 = vmatpush1.bf16.msra.mxu1 %v2327_v23 }
 0x682   : > { %1729 = vmatprep.subr.bf16.mxu0 %v2328_v25  ;;  %1770 = vmatprep.subr.bf16.mxu1 %v2329_v27 }
 0x685   : > { %1730 = vmatpush1.bf16.msra.mxu0 %v2330_v44  ;;  %1771 = vmatpush1.bf16.msra.mxu1 %v2331_v33 }
 0x686   : > { %1731 = vmatprep.subr.bf16.mxu0 %v2332_v34  ;;  %1772 = vmatprep.subr.bf16.mxu1 %v2333_v31 }
 0x689   : > { %1732 = vmatpush1.bf16.msra.mxu0 %v2334_v35  ;;  %1773 = vmatpush1.bf16.msra.mxu1 %v2335_v53 }
 0x73f   : > { %v1635_v28 = vpop.f32.mrb[40].mxu0  ;;  %v1676_v24 = vpop.f32.mrb[40].mxu1 }
 0x740   : > { %v1683_v21 = vadd.f32 %v1635_v28, %v3094_v10  ;;  %v1685_v12 = vadd.f32 %v1676_v24, %v3095_v32  ;;  %v1637_v7 = vpop.f32.mrb[41].mxu0  ;;  %v1678_v11 = vpop.f32.mrb[41].mxu1 }
 0x741   : > { %v1684_v22 = vadd.f32 %v1637_v7, %v3096_v6  ;;  %v1686_v30 = vadd.f32 %v1678_v11, %v3097_v9  ;;  %v1639_v14 = vpop.f32.mrb[42].mxu0  ;;  %v1680_v38 = vpop.f32.mrb[42].mxu1 }
 0x742   : > { %v2040_v39 = vmul.f32 -1.442695, %v1683_v21  ;;  %v1640_v40 = vpop.f32.mrb[43].mxu0  ;;  %v1681_v41 = vpop.f32.mrb[43].mxu1  ;;  %v2042_v57 = vmul.f32 -1.442695, %v1685_v12 }
 0x743   : > { %v2041_v56 = vmul.f32 -1.442695, %v1684_v22 }
 0x744   : > { %2272 = vpow2.f32 %v2040_v39 }
 0x745   : > { %2274 = vpow2.f32 %v2041_v56 }
 0x746   : > { %2276 = vtanh.f32 %v1686_v30 }
 0x747   : > { %2278 = vpow2.f32 %v2042_v57 }
 0x74e   : > { %v2273_v58 = vpop.eup %2272 }
 0x74f   : > { %v1696_v59 = vadd.f32 1.0, %v2273_v58  ;;  %v2275_v60 = vpop.eup %2274 }
 0x750   : > { %v1697_v61 = vadd.f32 1.0, %v2275_v60  ;;  %v2277_v63 = vpop.eup %2276 }
 0x751   : > { %2280 = vrcp.f32 %v1696_v59  ;;  %v2279_v1 = vpop.eup %2278 }
 0x752   : > { %2282 = vrcp.f32 %v1697_v61  ;;  %v1698_v3 = vadd.f32 1.0, %v2279_v1 }
 0x754   : > { %2284 = vrcp.f32 %v1698_v3 }
 0x75b   : > { %v2281_v42 = vpop.eup %2280 }
 0x75c   : > { %v1707_v2 = vmul.f32 %v2281_v42, %v2277_v63  ;;  %v2283_v43 = vpop.eup %2282 }
 0x75d   : > { %v1706_v45 = vmul.f32 %v2283_v43, %v2995_v16 }
 0x75e   : > { %v2285_v46 = vpop.eup %2284 }
 0x75f   : > { %v1708_v4 = vadd.f32 %v1707_v2, %v1706_v45 }
 0x761   : > { %2286 = vtanh.f32 %v1708_v4 }
 0x76b   : > { %v2287_v5 = vpop.eup %2286 }
 0x76c   : > { %v1710_v47 = vmul.f32 %v2287_v5, %v2285_v46 }
 0x76e   : > { %v1716_v36 = vpack.c.bf16 %v1710_v47, %v1710_v47 }
 0x770   : > { %1750 = vmatmul.mubr.bf16.vlgmr.msra.gmra.mrb[44].mxu0 %v1716_v36  ;;  %1791 = vmatmul.mubr.bf16.vlgmr.msra.gmra.mrb[44].mxu1 %v1716_v36 }
 0x843   : > { %v1751_v37 = vpop.f32.mrb[44].mxu0  ;;  %v1792_v48 = vpop.f32.mrb[44].mxu1 }
 0x844   : > { %v1799_v50 = vadd.f32 %v1751_v37, %v3098_v49  ;;  %v1801_v52 = vadd.f32 %v1792_v48, %v3099_v51  ;;  %v1753_v54 = vpop.f32.mrb[45].mxu0  ;;  %v1794_v55 = vpop.f32.mrb[45].mxu1 }
 0x845   : > { %v1800_v13 = vadd.f32 %v1753_v54, %v3100_v62  ;;  %v1802_v17 = vadd.f32 %v1794_v55, %v3101_v15  ;;  %v1755_v16 = vpop.f32.mrb[46].mxu0  ;;  %v1796_v0 = vpop.f32.mrb[46].mxu1 }
 0x846   : > { %v2043_v18 = vmul.f32 -1.442695, %v1799_v50  ;;  %v1756_v19 = vpop.f32.mrb[47].mxu0  ;;  %v1797_v20 = vpop.f32.mrb[47].mxu1  ;;  %v2045_v26 = vmul.f32 -1.442695, %v1801_v52 }
 0x847   : > { %v2044_v29 = vmul.f32 -1.442695, %v1800_v13 }
 0x848   : > { %2288 = vpow2.f32 %v2043_v18 }
 0x849   : > { %2290 = vpow2.f32 %v2044_v29 }
 0x84a   : > { %2292 = vtanh.f32 %v1802_v17 }
 0x84b   : > { %2294 = vpow2.f32 %v2045_v26 }
 0x852   : > { %v2289_v8 = vpop.eup %2288 }
 0x853   : > { %v1812_v23 = vadd.f32 1.0, %v2289_v8  ;;  %v2291_v25 = vpop.eup %2290 }
 0x854   : > { %v1813_v27 = vadd.f32 1.0, %v2291_v25  ;;  %v2293_v44 = vpop.eup %2292 }
 0x855   : > { %2296 = vrcp.f32 %v1812_v23  ;;  %v2295_v33 = vpop.eup %2294 }
 0x856   : > { %2298 = vrcp.f32 %v1813_v27  ;;  %v1814_v53 = vadd.f32 1.0, %v2295_v33 }
 0x858   : > { %2300 = vrcp.f32 %v1814_v53 }
 0x85f   : > { %v2297_v34 = vpop.eup %2296 }
 0x860   : > { %v1823_v31 = vmul.f32 %v2297_v34, %v2293_v44  ;;  %v2299_v35 = vpop.eup %2298 }
 0x861   : > { %v1822_v28 = vmul.f32 %v2299_v35, %v1708_v4 }
 0x862   : > { %v2301_v10 = vpop.eup %2300 }
 0x863   : > { %v1824_v24 = vadd.f32 %v1823_v31, %v1822_v28 }
 0x865   : > { %2302 = vtanh.f32 %v1824_v24 }
 0x86f   : > { %v2303_v21 = vpop.eup %2302 }
 0x870   : > { %v1826_v32 = vmul.f32 %v2303_v21, %v2301_v10 }
 0x872   : > { %1827 = vst [vmem:[%s283_s11] sm:$0xff] %v1826_v32 }
 0x873 PF: > { %s14_s17 = sadd.s32 1, %s2358_s17   ;;  %s3102_s15 = smov %s2354_s16 }
 0x874   : > { %p11_p5 = scmp.ge.s32.totalorder %s14_s17, 5   ;;  %s3103_s16 = smov %s3105_s18 }
 0x876   :  { %13 = sbr.rel (!%p11_p5) target bundleno = 2 (0x2), region = 82 }

</bundles_post_ra>
